<compile_context>
chip_gen: v7x
topology: tpu7x:2x2x1
jax: 0.10.0
libtpu: 0.0.40
codegen_flags: <defaults>
</compile_context>

<pallas_src>
import functools

import jax
import jax.numpy as jnp
from jax import lax
from jax.experimental import pallas as pl
from jax.experimental.pallas import tpu as pltpu


def _round_up(v, m):
    return ((v + m - 1) // m) * m


def _compute_pad(kernel, stride, size):
    # Identical to Unit3D.compute_pad
    if size % stride == 0:
        return max(kernel - stride, 0)
    return max(kernel - size % stride, 0)


def _make_conv_stats_kernel(KH, KW, Wp, M):
    """Conv (per temporal tap) + per-block BN partial sums.

    Refs:
      x_ref:    (L, Cin)        bf16  flattened padded plane at t = to*st_t + kt
      w_ref:    (KH*KW, Cin, C) bf16  weights for this kt (C = Cout padded to 128)
      mask_ref: (M, 1)          f32   1.0 for valid rows (w < Wo), else 0.0
      y_ref:    (M, C)          bf16  conv output (flat rows, junk cols incl.)
      stats_ref:(2, C)          f32   [sum, sum of squares] over valid rows
      acc_ref:  (M, C)          f32   scratch accumulator across kt
    """
    KHW = KH * KW

    def kernel(x_ref, w_ref, mask_ref, y_ref, stats_ref, acc_ref):
        kt = pl.program_id(2)

        @pl.when(kt == 0)
        def _init():
            acc_ref[...] = jnp.zeros_like(acc_ref)

        contrib = None
        for o in range(KHW):           # static unroll over spatial taps
            kh, kw = divmod(o, KW)
            off = kh * Wp + kw
            lhs = x_ref[pl.ds(off, M), :]                    # (M, Cin) bf16
            part = jnp.dot(lhs, w_ref[o],
                           preferred_element_type=jnp.float32)
            contrib = part if contrib is None else contrib + part
        acc_ref[...] += contrib

        @pl.when(kt == pl.num_programs(2) - 1)
        def _finalize():
            y = acc_ref[...]                                 # f32 accumulator
            y_ref[...] = y.astype(y_ref.dtype)
            m = mask_ref[...]
            ym = y * m
            stats_ref[0:1, :] = jnp.sum(ym, axis=0, keepdims=True)
            stats_ref[1:2, :] = jnp.sum(ym * y, axis=0, keepdims=True)

    return kernel


def _bn_relu_kernel(y_ref, scale_ref, shift_ref, o_ref):
    y = y_ref[...].astype(jnp.float32)
    o_ref[...] = jnp.maximum(y * scale_ref[...] + shift_ref[...], 0.0).astype(
        o_ref.dtype)


def unit3d_forward(
    x,                 # (N, Cin, T, H, W) f32
    conv_weight,       # (Cout, Cin, KT, KH, KW) f32
    bn_gamma,          # (Cout,)
    bn_beta,           # (Cout,)
    bn_gamma_target,   # (Cout,)
    bn_beta_target,    # (Cout,)
    *,
    kernel_shape=(3, 3, 3),
    stride=(1, 1, 1),
    is_target=False,
    double_BN=True,
    eps=1e-3,
):
    N, Cin, T, H, W = x.shape
    Cout = conv_weight.shape[0]
    KT, KH, KW = kernel_shape
    st_t, st_h, st_w = stride
    if st_h != 1 or st_w != 1:
        # TODO(synk): spatial strides > 1 (only the 7x7x7 stem) need strided row
        # selection inside the kernel; not implemented in the Pallas path.
        raise NotImplementedError("spatial stride must be 1 in the Pallas path")

    # --- SAME padding, exactly as Unit3D.compute_pad / F.pad ---
    pad_t = _compute_pad(KT, st_t, T)
    pad_h = _compute_pad(KH, st_h, H)
    pad_w = _compute_pad(KW, st_w, W)
    pt_f, pt_b = pad_t // 2, pad_t - pad_t // 2
    ph_f, ph_b = pad_h // 2, pad_h - pad_h // 2
    pw_f, pw_b = pad_w // 2, pad_w - pad_w // 2

    Tp, Hp, Wp = T + pad_t, H + pad_h, W + pad_w
    To = (Tp - KT) // st_t + 1
    Ho = Hp - KH + 1
    Wo = Wp - KW + 1
    M = Ho * Wp                 # flat accumulator rows (cols Wo..Wp-1 are junk)
    L = (Hp + 1) * Wp           # flattened plane + one zero guard row

    # Channel-last, padded (one extra zero H row as shifted-read guard), flat.
    xt = jnp.transpose(x, (0, 2, 3, 4, 1))                       # (N,T,H,W,Cin)
    xp = jnp.pad(xt, ((0, 0), (pt_f, pt_b), (ph_f, ph_b + 1),
                      (pw_f, pw_b), (0, 0)))
    x_flat = xp.reshape(N, Tp, L, Cin).astype(jnp.bfloat16)

    Cpad = _round_up(Cout, 128)

    # Weights: (Cout,Cin,KT,KH,KW) -> (KT, KH*KW, Cin, Cpad), lane-padded, bf16.
    w = jnp.transpose(conv_weight, (2, 3, 4, 1, 0)).reshape(KT, KH * KW, Cin, Cout)
    w = jnp.pad(w, ((0, 0), (0, 0), (0, 0), (0, Cpad - Cout))).astype(jnp.bfloat16)

    # Valid-row mask over the flat accumulator rows (keeps BN stats over the
    # true P = N*To*Ho*Wo positions only).
    mask = ((jnp.arange(M) % Wp) < Wo).astype(jnp.float32).reshape(M, 1)

    conv_kernel = _make_conv_stats_kernel(KH, KW, Wp, M)
    y1, stats = pl.pallas_call(
        conv_kernel,
        out_shape=(
            jax.ShapeDtypeStruct((N, To, M, Cpad), jnp.bfloat16),
            jax.ShapeDtypeStruct((N, To, 2, Cpad), jnp.float32),
        ),
        grid=(N, To, KT),
        in_specs=[
            pl.BlockSpec((None, None, L, Cin),
                         lambda n, t, k: (n, t * st_t + k, 0, 0)),
            pl.BlockSpec((None, KH * KW, Cin, Cpad),
                         lambda n, t, k: (k, 0, 0, 0)),
            pl.BlockSpec((M, 1), lambda n, t, k: (0, 0)),
        ],
        out_specs=(
            pl.BlockSpec((None, None, M, Cpad), lambda n, t, k: (n, t, 0, 0)),
            pl.BlockSpec((None, None, 2, Cpad), lambda n, t, k: (n, t, 0, 0)),
        ),
        scratch_shapes=[pltpu.VMEM((M, Cpad), jnp.float32)],
        compiler_params=pltpu.CompilerParams(
            dimension_semantics=("parallel", "parallel", "arbitrary")),
    )(x_flat, w, mask)

    # --- Global BN stats (training mode, biased variance) over the true P ---
    Pn = float(N * To * Ho * Wo)
    tot = jnp.sum(stats, axis=(0, 1))                 # (2, Cpad)
    mean = tot[0] / Pn
    var = tot[1] / Pn - mean * mean

    use_target = bool(double_BN and is_target)
    gamma = bn_gamma_target if use_target else bn_gamma
    beta = bn_beta_target if use_target else bn_beta
    gamma = jnp.pad(gamma.astype(jnp.float32), (0, Cpad - Cout))
    beta = jnp.pad(beta.astype(jnp.float32), (0, Cpad - Cout))
    scale = gamma * lax.rsqrt(var + eps)
    shift = beta - mean * scale

    # --- Tiny second pass: y*scale + shift fused with ReLU (lane dense) ---
    y2 = pl.pallas_call(
        _bn_relu_kernel,
        out_shape=jax.ShapeDtypeStruct((N, To, M, Cpad), jnp.float32),
        grid=(N, To),
        in_specs=[
            pl.BlockSpec((None, None, M, Cpad), lambda n, t: (n, t, 0, 0)),
            pl.BlockSpec((1, Cpad), lambda n, t: (0, 0)),
            pl.BlockSpec((1, Cpad), lambda n, t: (0, 0)),
        ],
        out_specs=pl.BlockSpec((None, None, M, Cpad), lambda n, t: (n, t, 0, 0)),
        compiler_params=pltpu.CompilerParams(
            dimension_semantics=("parallel", "parallel")),
    )(y1, scale.reshape(1, Cpad), shift.reshape(1, Cpad))

    # Crop junk width columns and channel padding; NCTHW only at the boundary
    # (keep channel-last when stacking Unit3Ds to avoid this transpose).
    out = y2.reshape(N, To, Ho, Wp, Cpad)[:, :, :, :Wo, :Cout]
    return jnp.transpose(out, (0, 4, 1, 2, 3))


def _reference(x, conv_weight, gamma, beta, *, kernel_shape, stride, eps=1e-3):
    """Pure-JAX f32 reference matching the PyTorch Unit3D forward."""
    _, _, T, H, W = x.shape
    KT, KH, KW = kernel_shape
    st_t, st_h, st_w = stride
    pad_t = _compute_pad(KT, st_t, T)
    pad_h = _compute_pad(KH, st_h, H)
    pad_w = _compute_pad(KW, st_w, W)
    xp = jnp.pad(x, ((0, 0), (0, 0),
                     (pad_t // 2, pad_t - pad_t // 2),
                     (pad_h // 2, pad_h - pad_h // 2),
                     (pad_w // 2, pad_w - pad_w // 2)))
    y = lax.conv_general_dilated(
        xp, conv_weight, window_strides=stride, padding="VALID",
        dimension_numbers=("NCDHW", "OIDHW", "NCDHW"),
        precision=lax.Precision.HIGHEST)
    mean = jnp.mean(y, axis=(0, 2, 3, 4), keepdims=True)
    var = jnp.mean((y - mean) ** 2, axis=(0, 2, 3, 4), keepdims=True)
    g = gamma.reshape(1, -1, 1, 1, 1)
    b = beta.reshape(1, -1, 1, 1, 1)
    return jnp.maximum((y - mean) * lax.rsqrt(var + eps) * g + b, 0.0)


if __name__ == "__main__":
    N, Cin, T, H, W = 2, 4, 4, 8, 8
    Cout = 8

    key = jax.random.PRNGKey(0)
    k_x, k_w, k_g, k_b, k_gt, k_bt, k_w1 = jax.random.split(key, 7)

    x = jax.random.normal(k_x, (N, Cin, T, H, W), dtype=jnp.float32)
    bn_gamma = 1.0 + 0.1 * jax.random.normal(k_g, (Cout,), dtype=jnp.float32)
    bn_beta = 0.1 * jax.random.normal(k_b, (Cout,), dtype=jnp.float32)
    bn_gamma_t = 1.0 + 0.1 * jax.random.normal(k_gt, (Cout,), dtype=jnp.float32)
    bn_beta_t = 0.1 * jax.random.normal(k_bt, (Cout,), dtype=jnp.float32)

    # --- 3x3x3 Unit3D (the Inception-branch 3x3 conv) ---
    ks3 = (3, 3, 3)
    w3 = jax.random.normal(k_w, (Cout, Cin) + ks3, dtype=jnp.float32) * 0.1
    fwd3 = jax.jit(functools.partial(
        unit3d_forward, kernel_shape=ks3, stride=(1, 1, 1),
        is_target=False, double_BN=True))
    out3 = jax.block_until_ready(
        fwd3(x, w3, bn_gamma, bn_beta, bn_gamma_t, bn_beta_t))
    assert out3.shape == (N, Cout, T, H, W), out3.shape
    assert bool(jnp.all(jnp.isfinite(out3)))
    ref3 = _reference(x, w3, bn_gamma, bn_beta, kernel_shape=ks3,
                      stride=(1, 1, 1))
    assert float(jnp.max(jnp.abs(out3 - ref3))) < 0.15

    # --- 1x1x1 Unit3D (the most common I3D block) ---
    ks1 = (1, 1, 1)
    w1 = jax.random.normal(k_w1, (Cout, Cin) + ks1, dtype=jnp.float32) * 0.1
    fwd1 = jax.jit(functools.partial(
        unit3d_forward, kernel_shape=ks1, stride=(1, 1, 1),
        is_target=True, double_BN=True))
    out1 = jax.block_until_ready(
        fwd1(x, w1, bn_gamma, bn_beta, bn_gamma_t, bn_beta_t))
    assert out1.shape == (N, Cout, T, H, W), out1.shape
    assert bool(jnp.all(jnp.isfinite(out1)))
    ref1 = _reference(x, w1, bn_gamma_t, bn_beta_t, kernel_shape=ks1,
                      stride=(1, 1, 1))
    assert float(jnp.max(jnp.abs(out1 - ref1))) < 0.15

    print("KERNEL_OK")
</pallas_src>

<mosaic_0001>
module attributes {stable_mosaic.version = 11 : i64} {
  func.func @kernel(%arg0: i32, %arg1: i32, %arg2: i32, %arg3: memref<1x1x110x4xbf16, #tpu.memory_space<vmem>>, %arg4: memref<1x9x4x128xbf16, #tpu.memory_space<vmem>>, %arg5: memref<80x1xf32, #tpu.memory_space<vmem>>, %arg6: memref<1x1x80x128xbf16, #tpu.memory_space<vmem>>, %arg7: memref<1x1x2x128xf32, #tpu.memory_space<vmem>>, %arg8: memref<80x128xf32, #tpu.memory_space<vmem>>) attributes {dimension_semantics = [#tpu.dimension_semantics<parallel>, #tpu.dimension_semantics<parallel>, #tpu.dimension_semantics<arbitrary>], iteration_bounds = array<i64: 2, 4, 3>, scalar_prefetch = 0 : i64, scratch_operands = 1 : i64, tpu.core_type = #tpu.core_type<tc>, window_params = [{transform_indices = @transform_0, window_bounds = array<i64: 1, 1, 110, 4>}, {transform_indices = @transform_1, window_bounds = array<i64: 1, 9, 4, 128>}, {pipeline_mode = #tpu.pipeline_mode<synchronous>, transform_indices = @transform_2, window_bounds = array<i64: 80, 1>}, {transform_indices = @transform_3, window_bounds = array<i64: 1, 1, 80, 128>}, {transform_indices = @transform_4, window_bounds = array<i64: 1, 1, 2, 128>}]} {
    %c0_i32 = arith.constant 0 : i32
    %0 = arith.cmpi eq, %arg2, %c0_i32 : i32
    %1 = arith.extui %0 : i1 to i32
    %c0_i32_0 = arith.constant 0 : i32
    %2 = arith.cmpi ne, %1, %c0_i32_0 : i32
    scf.if %2 {
      %cst_71 = arith.constant 0.000000e+00 : f32
      %62 = vector.broadcast %cst_71 : f32 to vector<80x128xf32>
      %c0_72 = arith.constant 0 : index
      %c0_73 = arith.constant 0 : index
      %63 = vector.load %arg8[%c0_72, %c0_73] : memref<80x128xf32, #tpu.memory_space<vmem>>, vector<80x128xf32>
      tpu.vector_store %arg8[%c0_72, %c0_73], %62 {strides = array<i32>} : memref<80x128xf32, #tpu.memory_space<vmem>>, vector<80x128xf32>,
    } else {
    }
    %c0 = arith.constant 0 : index
    %c0_1 = arith.constant 0 : index
    %c0_2 = arith.constant 0 : index
    %c0_3 = arith.constant 0 : index
    %3 = vector.load %arg3[%c0, %c0_1, %c0_2, %c0_3] : memref<1x1x110x4xbf16, #tpu.memory_space<vmem>>, vector<1x1x80x4xbf16>
    %4 = vector.shape_cast %3 : vector<1x1x80x4xbf16> to vector<80x4xbf16>
    %c0_4 = arith.constant 0 : index
    %c0_5 = arith.constant 0 : index
    %c0_6 = arith.constant 0 : index
    %c0_7 = arith.constant 0 : index
    %5 = vector.load %arg4[%c0_4, %c0_5, %c0_6, %c0_7] : memref<1x9x4x128xbf16, #tpu.memory_space<vmem>>, vector<1x1x4x128xbf16>
    %6 = vector.shape_cast %5 : vector<1x1x4x128xbf16> to vector<4x128xbf16>
    %cst = arith.constant dense<0.000000e+00> : vector<80x128xf32>
    %7 = tpu.matmul %4, %6, %cst {dimension_numbers = #tpu.dot_dimension_numbers<[1], [0], [0], [1], [0, 0, 1, 1], [], []>} : vector<80x4xbf16>, vector<4x128xbf16>, vector<80x128xf32> -> vector<80x128xf32>
    %c0_8 = arith.constant 0 : index
    %c0_9 = arith.constant 0 : index
    %c1 = arith.constant 1 : index
    %c0_10 = arith.constant 0 : index
    %8 = vector.load %arg3[%c0_8, %c0_9, %c1, %c0_10] : memref<1x1x110x4xbf16, #tpu.memory_space<vmem>>, vector<1x1x80x4xbf16>
    %9 = vector.shape_cast %8 : vector<1x1x80x4xbf16> to vector<80x4xbf16>
    %c0_11 = arith.constant 0 : index
    %c1_12 = arith.constant 1 : index
    %c0_13 = arith.constant 0 : index
    %c0_14 = arith.constant 0 : index
    %10 = vector.load %arg4[%c0_11, %c1_12, %c0_13, %c0_14] : memref<1x9x4x128xbf16, #tpu.memory_space<vmem>>, vector<1x1x4x128xbf16>
    %11 = vector.shape_cast %10 : vector<1x1x4x128xbf16> to vector<4x128xbf16>
    %cst_15 = arith.constant dense<0.000000e+00> : vector<80x128xf32>
    %12 = tpu.matmul %9, %11, %cst_15 {dimension_numbers = #tpu.dot_dimension_numbers<[1], [0], [0], [1], [0, 0, 1, 1], [], []>} : vector<80x4xbf16>, vector<4x128xbf16>, vector<80x128xf32> -> vector<80x128xf32>
    %13 = arith.addf %7, %12 : vector<80x128xf32>
    %c0_16 = arith.constant 0 : index
    %c0_17 = arith.constant 0 : index
    %c2 = arith.constant 2 : index
    %c0_18 = arith.constant 0 : index
    %14 = vector.load %arg3[%c0_16, %c0_17, %c2, %c0_18] : memref<1x1x110x4xbf16, #tpu.memory_space<vmem>>, vector<1x1x80x4xbf16>
    %15 = vector.shape_cast %14 : vector<1x1x80x4xbf16> to vector<80x4xbf16>
    %c0_19 = arith.constant 0 : index
    %c2_20 = arith.constant 2 : index
    %c0_21 = arith.constant 0 : index
    %c0_22 = arith.constant 0 : index
    %16 = vector.load %arg4[%c0_19, %c2_20, %c0_21, %c0_22] : memref<1x9x4x128xbf16, #tpu.memory_space<vmem>>, vector<1x1x4x128xbf16>
    %17 = vector.shape_cast %16 : vector<1x1x4x128xbf16> to vector<4x128xbf16>
    %cst_23 = arith.constant dense<0.000000e+00> : vector<80x128xf32>
    %18 = tpu.matmul %15, %17, %cst_23 {dimension_numbers = #tpu.dot_dimension_numbers<[1], [0], [0], [1], [0, 0, 1, 1], [], []>} : vector<80x4xbf16>, vector<4x128xbf16>, vector<80x128xf32> -> vector<80x128xf32>
    %19 = arith.addf %13, %18 : vector<80x128xf32>
    %c0_24 = arith.constant 0 : index
    %c0_25 = arith.constant 0 : index
    %c10 = arith.constant 10 : index
    %c0_26 = arith.constant 0 : index
    %20 = vector.load %arg3[%c0_24, %c0_25, %c10, %c0_26] : memref<1x1x110x4xbf16, #tpu.memory_space<vmem>>, vector<1x1x80x4xbf16>
    %21 = vector.shape_cast %20 : vector<1x1x80x4xbf16> to vector<80x4xbf16>
    %c0_27 = arith.constant 0 : index
    %c3 = arith.constant 3 : index
    %c0_28 = arith.constant 0 : index
    %c0_29 = arith.constant 0 : index
    %22 = vector.load %arg4[%c0_27, %c3, %c0_28, %c0_29] : memref<1x9x4x128xbf16, #tpu.memory_space<vmem>>, vector<1x1x4x128xbf16>
    %23 = vector.shape_cast %22 : vector<1x1x4x128xbf16> to vector<4x128xbf16>
    %cst_30 = arith.constant dense<0.000000e+00> : vector<80x128xf32>
    %24 = tpu.matmul %21, %23, %cst_30 {dimension_numbers = #tpu.dot_dimension_numbers<[1], [0], [0], [1], [0, 0, 1, 1], [], []>} : vector<80x4xbf16>, vector<4x128xbf16>, vector<80x128xf32> -> vector<80x128xf32>
    %25 = arith.addf %19, %24 : vector<80x128xf32>
    %c0_31 = arith.constant 0 : index
    %c0_32 = arith.constant 0 : index
    %c11 = arith.constant 11 : index
    %c0_33 = arith.constant 0 : index
    %26 = vector.load %arg3[%c0_31, %c0_32, %c11, %c0_33] : memref<1x1x110x4xbf16, #tpu.memory_space<vmem>>, vector<1x1x80x4xbf16>
    %27 = vector.shape_cast %26 : vector<1x1x80x4xbf16> to vector<80x4xbf16>
    %c0_34 = arith.constant 0 : index
    %c4 = arith.constant 4 : index
    %c0_35 = arith.constant 0 : index
    %c0_36 = arith.constant 0 : index
    %28 = vector.load %arg4[%c0_34, %c4, %c0_35, %c0_36] : memref<1x9x4x128xbf16, #tpu.memory_space<vmem>>, vector<1x1x4x128xbf16>
    %29 = vector.shape_cast %28 : vector<1x1x4x128xbf16> to vector<4x128xbf16>
    %cst_37 = arith.constant dense<0.000000e+00> : vector<80x128xf32>
    %30 = tpu.matmul %27, %29, %cst_37 {dimension_numbers = #tpu.dot_dimension_numbers<[1], [0], [0], [1], [0, 0, 1, 1], [], []>} : vector<80x4xbf16>, vector<4x128xbf16>, vector<80x128xf32> -> vector<80x128xf32>
    %31 = arith.addf %25, %30 : vector<80x128xf32>
    %c0_38 = arith.constant 0 : index
    %c0_39 = arith.constant 0 : index
    %c12 = arith.constant 12 : index
    %c0_40 = arith.constant 0 : index
    %32 = vector.load %arg3[%c0_38, %c0_39, %c12, %c0_40] : memref<1x1x110x4xbf16, #tpu.memory_space<vmem>>, vector<1x1x80x4xbf16>
    %33 = vector.shape_cast %32 : vector<1x1x80x4xbf16> to vector<80x4xbf16>
    %c0_41 = arith.constant 0 : index
    %c5 = arith.constant 5 : index
    %c0_42 = arith.constant 0 : index
    %c0_43 = arith.constant 0 : index
    %34 = vector.load %arg4[%c0_41, %c5, %c0_42, %c0_43] : memref<1x9x4x128xbf16, #tpu.memory_space<vmem>>, vector<1x1x4x128xbf16>
    %35 = vector.shape_cast %34 : vector<1x1x4x128xbf16> to vector<4x128xbf16>
    %cst_44 = arith.constant dense<0.000000e+00> : vector<80x128xf32>
    %36 = tpu.matmul %33, %35, %cst_44 {dimension_numbers = #tpu.dot_dimension_numbers<[1], [0], [0], [1], [0, 0, 1, 1], [], []>} : vector<80x4xbf16>, vector<4x128xbf16>, vector<80x128xf32> -> vector<80x128xf32>
    %37 = arith.addf %31, %36 : vector<80x128xf32>
    %c0_45 = arith.constant 0 : index
    %c0_46 = arith.constant 0 : index
    %c20 = arith.constant 20 : index
    %c0_47 = arith.constant 0 : index
    %38 = vector.load %arg3[%c0_45, %c0_46, %c20, %c0_47] : memref<1x1x110x4xbf16, #tpu.memory_space<vmem>>, vector<1x1x80x4xbf16>
    %39 = vector.shape_cast %38 : vector<1x1x80x4xbf16> to vector<80x4xbf16>
    %c0_48 = arith.constant 0 : index
    %c6 = arith.constant 6 : index
    %c0_49 = arith.constant 0 : index
    %c0_50 = arith.constant 0 : index
    %40 = vector.load %arg4[%c0_48, %c6, %c0_49, %c0_50] : memref<1x9x4x128xbf16, #tpu.memory_space<vmem>>, vector<1x1x4x128xbf16>
    %41 = vector.shape_cast %40 : vector<1x1x4x128xbf16> to vector<4x128xbf16>
    %cst_51 = arith.constant dense<0.000000e+00> : vector<80x128xf32>
    %42 = tpu.matmul %39, %41, %cst_51 {dimension_numbers = #tpu.dot_dimension_numbers<[1], [0], [0], [1], [0, 0, 1, 1], [], []>} : vector<80x4xbf16>, vector<4x128xbf16>, vector<80x128xf32> -> vector<80x128xf32>
    %43 = arith.addf %37, %42 : vector<80x128xf32>
    %c0_52 = arith.constant 0 : index
    %c0_53 = arith.constant 0 : index
    %c21 = arith.constant 21 : index
    %c0_54 = arith.constant 0 : index
    %44 = vector.load %arg3[%c0_52, %c0_53, %c21, %c0_54] : memref<1x1x110x4xbf16, #tpu.memory_space<vmem>>, vector<1x1x80x4xbf16>
    %45 = vector.shape_cast %44 : vector<1x1x80x4xbf16> to vector<80x4xbf16>
    %c0_55 = arith.constant 0 : index
    %c7 = arith.constant 7 : index
    %c0_56 = arith.constant 0 : index
    %c0_57 = arith.constant 0 : index
    %46 = vector.load %arg4[%c0_55, %c7, %c0_56, %c0_57] : memref<1x9x4x128xbf16, #tpu.memory_space<vmem>>, vector<1x1x4x128xbf16>
    %47 = vector.shape_cast %46 : vector<1x1x4x128xbf16> to vector<4x128xbf16>
    %cst_58 = arith.constant dense<0.000000e+00> : vector<80x128xf32>
    %48 = tpu.matmul %45, %47, %cst_58 {dimension_numbers = #tpu.dot_dimension_numbers<[1], [0], [0], [1], [0, 0, 1, 1], [], []>} : vector<80x4xbf16>, vector<4x128xbf16>, vector<80x128xf32> -> vector<80x128xf32>
    %49 = arith.addf %43, %48 : vector<80x128xf32>
    %c0_59 = arith.constant 0 : index
    %c0_60 = arith.constant 0 : index
    %c22 = arith.constant 22 : index
    %c0_61 = arith.constant 0 : index
    %50 = vector.load %arg3[%c0_59, %c0_60, %c22, %c0_61] : memref<1x1x110x4xbf16, #tpu.memory_space<vmem>>, vector<1x1x80x4xbf16>
    %51 = vector.shape_cast %50 : vector<1x1x80x4xbf16> to vector<80x4xbf16>
    %c0_62 = arith.constant 0 : index
    %c8 = arith.constant 8 : index
    %c0_63 = arith.constant 0 : index
    %c0_64 = arith.constant 0 : index
    %52 = vector.load %arg4[%c0_62, %c8, %c0_63, %c0_64] : memref<1x9x4x128xbf16, #tpu.memory_space<vmem>>, vector<1x1x4x128xbf16>
    %53 = vector.shape_cast %52 : vector<1x1x4x128xbf16> to vector<4x128xbf16>
    %cst_65 = arith.constant dense<0.000000e+00> : vector<80x128xf32>
    %54 = tpu.matmul %51, %53, %cst_65 {dimension_numbers = #tpu.dot_dimension_numbers<[1], [0], [0], [1], [0, 0, 1, 1], [], []>} : vector<80x4xbf16>, vector<4x128xbf16>, vector<80x128xf32> -> vector<80x128xf32>
    %55 = arith.addf %49, %54 : vector<80x128xf32>
    %c0_66 = arith.constant 0 : index
    %c0_67 = arith.constant 0 : index
    %56 = vector.load %arg8[%c0_66, %c0_67] : memref<80x128xf32, #tpu.memory_space<vmem>>, vector<80x128xf32>
    %57 = arith.addf %56, %55 : vector<80x128xf32>
    %c0_68 = arith.constant 0 : index
    %c0_69 = arith.constant 0 : index
    %58 = vector.load %arg8[%c0_68, %c0_69] : memref<80x128xf32, #tpu.memory_space<vmem>>, vector<80x128xf32>
    tpu.vector_store %arg8[%c0_68, %c0_69], %57 {strides = array<i32>} : memref<80x128xf32, #tpu.memory_space<vmem>>, vector<80x128xf32>,
    %c2_i32 = arith.constant 2 : i32
    %59 = arith.cmpi eq, %arg2, %c2_i32 : i32
    %60 = arith.extui %59 : i1 to i32
    %c0_i32_70 = arith.constant 0 : i32
    %61 = arith.cmpi ne, %60, %c0_i32_70 : i32
    scf.if %61 {
      %c0_71 = arith.constant 0 : index
      %c0_72 = arith.constant 0 : index
      %62 = vector.load %arg8[%c0_71, %c0_72] : memref<80x128xf32, #tpu.memory_space<vmem>>, vector<80x128xf32>
      %63 = arith.truncf %62 : vector<80x128xf32> to vector<80x128xbf16>
      %c0_73 = arith.constant 0 : index
      %c0_74 = arith.constant 0 : index
      %c0_75 = arith.constant 0 : index
      %c0_76 = arith.constant 0 : index
      %64 = vector.load %arg6[%c0_73, %c0_74, %c0_75, %c0_76] : memref<1x1x80x128xbf16, #tpu.memory_space<vmem>>, vector<1x1x80x128xbf16>
      %65 = vector.shape_cast %64 : vector<1x1x80x128xbf16> to vector<80x128xbf16>
      %66 = vector.shape_cast %63 : vector<80x128xbf16> to vector<1x1x80x128xbf16>
      tpu.vector_store %arg6[%c0_73, %c0_74, %c0_75, %c0_76], %66 {strides = array<i32>} : memref<1x1x80x128xbf16, #tpu.memory_space<vmem>>, vector<1x1x80x128xbf16>,
      %c0_77 = arith.constant 0 : index
      %c0_78 = arith.constant 0 : index
      %67 = vector.load %arg5[%c0_77, %c0_78] : memref<80x1xf32, #tpu.memory_space<vmem>>, vector<80x1xf32>
      %68 = vector.broadcast %67 : vector<80x1xf32> to vector<80x128xf32>
      %69 = arith.mulf %62, %68 : vector<80x128xf32>
      %cst_79 = arith.constant dense<0.000000e+00> : vector<128xf32>
      %70 = vector.multi_reduction <add>, %69, %cst_79 [0] : vector<80x128xf32> to vector<128xf32>
      %71 = vector.shape_cast %70 : vector<128xf32> to vector<1x128xf32>
      %c0_80 = arith.constant 0 : index
      %c0_81 = arith.constant 0 : index
      %c0_82 = arith.constant 0 : index
      %c0_83 = arith.constant 0 : index
      %72 = vector.load %arg7[%c0_80, %c0_81, %c0_82, %c0_83] : memref<1x1x2x128xf32, #tpu.memory_space<vmem>>, vector<1x1x1x128xf32>
      %73 = vector.shape_cast %72 : vector<1x1x1x128xf32> to vector<1x128xf32>
      %74 = vector.shape_cast %71 : vector<1x128xf32> to vector<1x1x1x128xf32>
      tpu.vector_store %arg7[%c0_80, %c0_81, %c0_82, %c0_83], %74 {strides = array<i32>} : memref<1x1x2x128xf32, #tpu.memory_space<vmem>>, vector<1x1x1x128xf32>,
      %75 = arith.mulf %69, %62 : vector<80x128xf32>
      %cst_84 = arith.constant dense<0.000000e+00> : vector<128xf32>
      %76 = vector.multi_reduction <add>, %75, %cst_84 [0] : vector<80x128xf32> to vector<128xf32>
      %77 = vector.shape_cast %76 : vector<128xf32> to vector<1x128xf32>
      %c0_85 = arith.constant 0 : index
      %c0_86 = arith.constant 0 : index
      %c1_87 = arith.constant 1 : index
      %c0_88 = arith.constant 0 : index
      %78 = vector.load %arg7[%c0_85, %c0_86, %c1_87, %c0_88] : memref<1x1x2x128xf32, #tpu.memory_space<vmem>>, vector<1x1x1x128xf32>
      %79 = vector.shape_cast %78 : vector<1x1x1x128xf32> to vector<1x128xf32>
      %80 = vector.shape_cast %77 : vector<1x128xf32> to vector<1x1x1x128xf32>
      tpu.vector_store %arg7[%c0_85, %c0_86, %c1_87, %c0_88], %80 {strides = array<i32>} : memref<1x1x2x128xf32, #tpu.memory_space<vmem>>, vector<1x1x1x128xf32>,
    } else {
    }
    return
  }
  func.func @transform_0(%arg0: i32, %arg1: i32, %arg2: i32) -> (i32, i32, i32, i32) {
    %c1_i32 = arith.constant 1 : i32
    %0 = arith.muli %arg1, %c1_i32 : i32
    %1 = arith.addi %0, %arg2 : i32
    %c0_i32 = arith.constant 0 : i32
    %c0_i32_0 = arith.constant 0 : i32
    %c0_i32_1 = arith.constant 0 : i32
    return %arg0, %1, %c0_i32, %c0_i32_0 : i32, i32, i32, i32
  }
  func.func @transform_1(%arg0: i32, %arg1: i32, %arg2: i32) -> (i32, i32, i32, i32) {
    %c0_i32 = arith.constant 0 : i32
    %c0_i32_0 = arith.constant 0 : i32
    %c0_i32_1 = arith.constant 0 : i32
    %c0_i32_2 = arith.constant 0 : i32
    return %arg2, %c0_i32, %c0_i32_0, %c0_i32_1 : i32, i32, i32, i32
  }
  func.func @transform_2(%arg0: i32, %arg1: i32, %arg2: i32) -> (i32, i32) {
    %c0_i32 = arith.constant 0 : i32
    %c0_i32_0 = arith.constant 0 : i32
    %c0_i32_1 = arith.constant 0 : i32
    return %c0_i32, %c0_i32_0 : i32, i32
  }
  func.func @transform_3(%arg0: i32, %arg1: i32, %arg2: i32) -> (i32, i32, i32, i32) {
    %c0_i32 = arith.constant 0 : i32
    %c0_i32_0 = arith.constant 0 : i32
    %c0_i32_1 = arith.constant 0 : i32
    return %arg0, %arg1, %c0_i32, %c0_i32_0 : i32, i32, i32, i32
  }
  func.func @transform_4(%arg0: i32, %arg1: i32, %arg2: i32) -> (i32, i32, i32, i32) {
    %c0_i32 = arith.constant 0 : i32
    %c0_i32_0 = arith.constant 0 : i32
    %c0_i32_1 = arith.constant 0 : i32
    return %arg0, %arg1, %c0_i32, %c0_i32_0 : i32, i32, i32, i32
  }
}

module attributes {stable_mosaic.version = 11 : i64} {
  func.func @_bn_relu_kernel(%arg0: i32, %arg1: i32, %arg2: memref<1x1x80x128xbf16, #tpu.memory_space<vmem>>, %arg3: memref<1x128xf32, #tpu.memory_space<vmem>>, %arg4: memref<1x128xf32, #tpu.memory_space<vmem>>, %arg5: memref<1x1x80x128xf32, #tpu.memory_space<vmem>>) attributes {dimension_semantics = [#tpu.dimension_semantics<parallel>, #tpu.dimension_semantics<parallel>], iteration_bounds = array<i64: 2, 4>, scalar_prefetch = 0 : i64, scratch_operands = 0 : i64, tpu.core_type = #tpu.core_type<tc>, window_params = [{transform_indices = @transform_0, window_bounds = array<i64: 1, 1, 80, 128>}, {pipeline_mode = #tpu.pipeline_mode<synchronous>, transform_indices = @transform_1, window_bounds = array<i64: 1, 128>}, {pipeline_mode = #tpu.pipeline_mode<synchronous>, transform_indices = @transform_2, window_bounds = array<i64: 1, 128>}, {transform_indices = @transform_3, window_bounds = array<i64: 1, 1, 80, 128>}]} {
    %c0 = arith.constant 0 : index
    %c0_0 = arith.constant 0 : index
    %c0_1 = arith.constant 0 : index
    %c0_2 = arith.constant 0 : index
    %0 = vector.load %arg2[%c0, %c0_0, %c0_1, %c0_2] : memref<1x1x80x128xbf16, #tpu.memory_space<vmem>>, vector<1x1x80x128xbf16>
    %1 = vector.shape_cast %0 : vector<1x1x80x128xbf16> to vector<80x128xbf16>
    %2 = arith.extf %1 : vector<80x128xbf16> to vector<80x128xf32>
    %c0_3 = arith.constant 0 : index
    %c0_4 = arith.constant 0 : index
    %3 = vector.load %arg3[%c0_3, %c0_4] : memref<1x128xf32, #tpu.memory_space<vmem>>, vector<1x128xf32>
    %4 = vector.broadcast %3 : vector<1x128xf32> to vector<80x128xf32>
    %5 = arith.mulf %2, %4 : vector<80x128xf32>
    %c0_5 = arith.constant 0 : index
    %c0_6 = arith.constant 0 : index
    %6 = vector.load %arg4[%c0_5, %c0_6] : memref<1x128xf32, #tpu.memory_space<vmem>>, vector<1x128xf32>
    %7 = vector.broadcast %6 : vector<1x128xf32> to vector<80x128xf32>
    %8 = arith.addf %5, %7 : vector<80x128xf32>
    %cst = arith.constant 0.000000e+00 : f32
    %9 = vector.broadcast %cst : f32 to vector<80x128xf32>
    %10 = arith.maximumf %8, %9 : vector<80x128xf32>
    %c0_7 = arith.constant 0 : index
    %c0_8 = arith.constant 0 : index
    %c0_9 = arith.constant 0 : index
    %c0_10 = arith.constant 0 : index
    %11 = vector.load %arg5[%c0_7, %c0_8, %c0_9, %c0_10] : memref<1x1x80x128xf32, #tpu.memory_space<vmem>>, vector<1x1x80x128xf32>
    %12 = vector.shape_cast %11 : vector<1x1x80x128xf32> to vector<80x128xf32>
    %13 = vector.shape_cast %10 : vector<80x128xf32> to vector<1x1x80x128xf32>
    tpu.vector_store %arg5[%c0_7, %c0_8, %c0_9, %c0_10], %13 {strides = array<i32>} : memref<1x1x80x128xf32, #tpu.memory_space<vmem>>, vector<1x1x80x128xf32>,
    return
  }
  func.func @transform_0(%arg0: i32, %arg1: i32) -> (i32, i32, i32, i32) {
    %c0_i32 = arith.constant 0 : i32
    %c0_i32_0 = arith.constant 0 : i32
    %c0_i32_1 = arith.constant 0 : i32
    return %arg0, %arg1, %c0_i32, %c0_i32_0 : i32, i32, i32, i32
  }
  func.func @transform_1(%arg0: i32, %arg1: i32) -> (i32, i32) {
    %c0_i32 = arith.constant 0 : i32
    %c0_i32_0 = arith.constant 0 : i32
    %c0_i32_1 = arith.constant 0 : i32
    return %c0_i32, %c0_i32_0 : i32, i32
  }
  func.func @transform_2(%arg0: i32, %arg1: i32) -> (i32, i32) {
    %c0_i32 = arith.constant 0 : i32
    %c0_i32_0 = arith.constant 0 : i32
    %c0_i32_1 = arith.constant 0 : i32
    return %c0_i32, %c0_i32_0 : i32, i32
  }
  func.func @transform_3(%arg0: i32, %arg1: i32) -> (i32, i32, i32, i32) {
    %c0_i32 = arith.constant 0 : i32
    %c0_i32_0 = arith.constant 0 : i32
    %c0_i32_1 = arith.constant 0 : i32
    return %arg0, %arg1, %c0_i32, %c0_i32_0 : i32, i32, i32, i32
  }
}

</mosaic_0001>

<bundles_post_ra>
// kernel: unit3d_forward.3
= control target key start
LH: loop header
LB: loop body
LE: loop exit
PB: predicated region body
PF: predicated region fallthrough
CT: control target
= control target key end

     0   :  { %s513_s12 = smov 0   ;;  %s515_s13 = smov 0   ;;  %s593_s0 = inlined_call_operand.vmem [shape: bf16[2,4,80,128], index: 0, kind: input, shape index: {}]   ;;  %s594_s1 = inlined_call_operand.vmem [shape: f32[1,128], index: 1, kind: input, shape index: {}]   ;;  %s595_s2 = inlined_call_operand.vmem [shape: f32[1,128], index: 2, kind: input, shape index: {}]   ;;  %s596_s3 = inlined_call_operand.vmem [shape: f32[2,4,80,128], index: 3, kind: output, shape index: {}]  }
   0x1   :  { %s517_s14 = smov 0   ;;  %s519_s15 = smov 0  }
   0x2   :  { %s521_s16 = smov 0  }
   0x3 LB: > { %s22_s17 = sadd.s32 1, %s483_s14  ;;  %s25_s18 = sadd.s32 1, %s487_s15  ;;  %s491_s16 = sphi %s521_s16, %s13_s16   ;;  %s487_s15 = sphi %s519_s15, %s600_s15   ;;  %s483_s14 = sphi %s517_s14, %s599_s14   ;;  %s479_s13 = sphi %s515_s13, %s598_s13   ;;  %s475_s12 = sphi %s513_s12, %s597_s12  }
   0x4   : > { %p23_p0 = scmp.ge.s32.totalorder %s22_s17, 4  ;;  %p380_p1 = scmp.ge.s32.totalorder %s491_s16, 1 }
   0x5   : > { %p157_p2 = scmp.lt.s32.totalorder %s491_s16, 9 }
   0x6   : > { %s602_s17 = smov (%p23_p0, %s22_s17), 0  ;;  %s604_s18 = smov (!%p23_p0, %s25_s18), %s487_s15 }
   0x7   : > { %p158_p3 = pnand %p380_p1, %p157_p2  ;;  %p27_p4 = scmp.ge.s32.totalorder %s604_s18, 2 }
   0x8   : > { %p189_p5 = scmp.lt.s32.totalorder (!%p158_p3), %s479_s13, 1  ;;  %p191_p6 = scmp.lt.s32.totalorder (!%p158_p3), %s475_s12, 3  ;;  %v383_v0 = vld [vmem:[%s594_s1] ss:$0 sm:$0xff] (!%p158_p3) }
   0x9   : > { %s606_s18 = smov (%p27_p4, %s604_s18), 0  ;;  %161 = sbr.rel (%p158_p3) target bundleno = 41 (0x29), region = 32 }
   0xa   : > { %v384_v9 = vld [vmem:[%s595_s2] ss:$0 sm:$0xff] (!%p158_p3) }
  0x10   : > { %s608_s13 = smov (!%p189_p5, %s479_s13), 1  ;;  %s610_s12 = smov (!%p191_p6, %s475_s12), 3 }
  0x11   : > { %s412_s19 = smul.u32 40, %s608_s13 }
  0x12   : > { %s411_s20 = smul.u32 10, %s610_s12 }
  0x14   : > { %s543_s21 = sadd.s32 %s412_s19, %s411_s20 }
  0x15   : > { %s381_s22 = sshll.u32 %s543_s21, 2  ;;  %s382_s30 = sshll.u32 %s543_s21, 3 }
  0x16   : > { %s549_s25 = scalar_lea.vmem %s593_s0, %s381_s22  ;;  %s565_s6 = scalar_lea.vmem %s596_s3, %s382_s30 }
  0x17   : > { %v388_v1 = vld [vmem:[%s549_s25] sm:$0xff]   ;;  %v407_v2 = vld [vmem:[%s549_s25 + $0x8] sm:$0xff]   ;;  %v408_v3 = vld [vmem:[%s549_s25 + $0x10] sm:$0xff]  }
  0x18   : > { %v389_v4 = vunpack.c.l.bf16 %v388_v1  ;;  %v390_v5 = vunpack.c.h.bf16 %v388_v1  ;;  %v393_v6 = vunpack.c.l.bf16 %v407_v2  ;;  %v394_v7 = vunpack.c.h.bf16 %v407_v2  ;;  %v409_v8 = vld [vmem:[%s549_s25 + $0x18] sm:$0xff]   ;;  %v410_v30 = vld [vmem:[%s549_s25 + $0x20] sm:$0xff]  }
  0x19   : > { %v397_v10 = vunpack.c.l.bf16 %v408_v3  ;;  %v398_v11 = vunpack.c.h.bf16 %v408_v3  ;;  %v401_v12 = vunpack.c.l.bf16 %v409_v8  ;;  %v402_v13 = vunpack.c.h.bf16 %v409_v8 }
  0x1a   : > { %v234_v14 = vmul.f32 %v389_v4, %v383_v0  ;;  %v235_v15 = vmul.f32 %v390_v5, %v383_v0  ;;  %v236_v16 = vmul.f32 %v393_v6, %v383_v0  ;;  %v237_v17 = vmul.f32 %v394_v7, %v383_v0 }
  0x1b   : > { %v238_v18 = vmul.f32 %v397_v10, %v383_v0  ;;  %v239_v19 = vmul.f32 %v398_v11, %v383_v0  ;;  %v240_v20 = vmul.f32 %v401_v12, %v383_v0  ;;  %v241_v21 = vmul.f32 %v402_v13, %v383_v0 }
  0x1c   : > { %v251_v22 = vadd.f32 %v384_v9, %v234_v14  ;;  %v252_v23 = vadd.f32 %v384_v9, %v235_v15  ;;  %v253_v24 = vadd.f32 %v384_v9, %v236_v16  ;;  %v254_v25 = vadd.f32 %v384_v9, %v237_v17 }
  0x1d   : > { %v255_v26 = vadd.f32 %v384_v9, %v238_v18  ;;  %v256_v27 = vadd.f32 %v384_v9, %v239_v19  ;;  %v257_v28 = vadd.f32 %v384_v9, %v240_v20  ;;  %v258_v29 = vadd.f32 %v384_v9, %v241_v21 }
  0x1e   : > { %v261_v31 = vmax.f32 %v251_v22, 0.0  ;;  %v262_v32 = vmax.f32 %v252_v23, 0.0  ;;  %v263_v33 = vmax.f32 %v253_v24, 0.0  ;;  %v264_v34 = vmax.f32 %v254_v25, 0.0 }
  0x1f   : > { %v265_v35 = vmax.f32 %v255_v26, 0.0  ;;  %v266_v36 = vmax.f32 %v256_v27, 0.0  ;;  %v267_v37 = vmax.f32 %v257_v28, 0.0  ;;  %v268_v38 = vmax.f32 %v258_v29, 0.0 }
  0x20   : > { %271 = vst [vmem:[%s565_s6] sm:$0xff] %v261_v31  ;;  %272 = vst [vmem:[%s565_s6 + $0x8] sm:$0xff] %v262_v32  ;;  %v405_v39 = vunpack.c.l.bf16 %v410_v30  ;;  %v406_v40 = vunpack.c.h.bf16 %v410_v30 }
  0x21   : > { %273 = vst [vmem:[%s565_s6 + $0x10] sm:$0xff] %v263_v33  ;;  %274 = vst [vmem:[%s565_s6 + $0x18] sm:$0xff] %v264_v34 }
  0x22   : > { %275 = vst [vmem:[%s565_s6 + $0x20] sm:$0xff] %v265_v35  ;;  %276 = vst [vmem:[%s565_s6 + $0x28] sm:$0xff] %v266_v36  ;;  %v242_v41 = vmul.f32 %v405_v39, %v383_v0  ;;  %v243_v42 = vmul.f32 %v406_v40, %v383_v0 }
  0x23   : > { %277 = vst [vmem:[%s565_s6 + $0x30] sm:$0xff] %v267_v37  ;;  %278 = vst [vmem:[%s565_s6 + $0x38] sm:$0xff] %v268_v38 }
  0x24   : > { %v259_v43 = vadd.f32 %v384_v9, %v242_v41  ;;  %v260_v44 = vadd.f32 %v384_v9, %v243_v42 }
  0x26   : > { %v269_v45 = vmax.f32 %v259_v43, 0.0  ;;  %v270_v46 = vmax.f32 %v260_v44, 0.0 }
  0x28   : > { %279 = vst [vmem:[%s565_s6 + $0x40] sm:$0xff] %v269_v45  ;;  %280 = vst [vmem:[%s565_s6 + $0x48] sm:$0xff] %v270_v46 }
  0x29 PF: > { %s13_s16 = sadd.s32 1, %s491_s16   ;;  %s597_s12 = smov %s483_s14 }
  0x2a   : > { %p10_p7 = scmp.ge.s32.totalorder %s13_s16, 10   ;;  %s598_s13 = smov %s487_s15 }
  0x2b   : > { %s599_s14 = smov %s602_s17  ;;  %s600_s15 = smov %s606_s18 }
  0x2c   :  { %12 = sbr.rel (!%p10_p7) target bundleno = 3 (0x3), region = 62 }

// kernel: unit3d_forward.2
= control target key start
LH: loop header
LB: loop body
LE: loop exit
PB: predicated region body
PF: predicated region fallthrough
CT: control target
= control target key end

     0   :  { %s2489_s15 = smov 0   ;;  %s2491_s16 = smov 0   ;;  %s2955_s0 = inlined_call_operand.vmem [shape: bf16[2,6,110,4], index: 0, kind: input, shape index: {}]   ;;  %s2956_s1 = inlined_call_operand.vmem [shape: bf16[3,9,4,128], index: 1, kind: input, shape index: {}]   ;;  %s2957_s2 = inlined_call_operand.vmem [shape: f32[80,1], index: 2, kind: input, shape index: {}]   ;;  %s2958_s3 = inlined_call_operand.vmem [shape: bf16[2,4,80,128], index: 3, kind: output, shape index: {0}]   ;;  %s2959_s4 = inlined_call_operand.vmem [shape: f32[2,4,2,128], index: 4, kind: output, shape index: {1}]  }
   0x1   :  { %2960 = sst [smem:[#allocation4_spill]] %s2955_s0  ;;  %s2493_s17 = smov 0  }
   0x2   :  { %s2495_s18 = smov 0   ;;  %s2497_s19 = smov 0  }
   0x3   :  { %s2499_s20 = smov 0   ;;  %s2501_s21 = smov 0  }
   0x4 LB: > { %s27_s22 = sadd.s32 1, %s2446_s18  ;;  %s30_s23 = sadd.s32 1, %s2450_s19  ;;  %s2458_s21 = sphi %s2501_s21, %s15_s21   ;;  %s2454_s20 = sphi %s2499_s20, %s2969_s20   ;;  %s2450_s19 = sphi %s2497_s19, %s2968_s19   ;;  %s2446_s18 = sphi %s2495_s18, %s2967_s18   ;;  %s2442_s17 = sphi %s2493_s17, %s2966_s17   ;;  %s2438_s16 = sphi %s2491_s16, %s2965_s16   ;;  %s2434_s15 = sphi %s2489_s15, %s2964_s15  }
   0x5   : > { %p28_p0 = scmp.ge.s32.totalorder %s27_s22, 3  ;;  %p1925_p1 = scmp.ge.s32.totalorder %s2458_s21, 1 }
   0x6   : > { %p208_p2 = scmp.lt.s32.totalorder %s2458_s21, 25  ;;  %s34_s24 = sadd.s32 1, %s2454_s20 }
   0x7   : > { %s2971_s22 = smov (%p28_p0, %s27_s22), 0  ;;  %s2973_s23 = smov (!%p28_p0, %s30_s23), %s2450_s19 }
   0x8   : > { %p209_p3 = pnand %p1925_p1, %p208_p2  ;;  %p32_p4 = scmp.ge.s32.totalorder %s2973_s23, 4 }
   0x9   : > { %s256_s25 = sadd.s32 (!%p209_p3), %s2434_s15, %s2438_s16  ;;  %p257_p6 = scmp.lt.s32.totalorder (!%p209_p3), %s2442_s17, 1 }
   0xa   : > { %s2975_s23 = smov (%p32_p4, %s2973_s23), 0  ;;  %s2977_s24 = smov (!%p32_p4, %s34_s24), %s2454_s20 }
   0xb   : > { %p36_p5 = scmp.ge.s32.totalorder %s2977_s24, 2  ;;  %212 = sbr.rel (%p209_p3) target bundleno = 591 (0x24f), region = 32 }
   0xc   : > { %p259_p7 = scmp.lt.s32.totalorder (!%p209_p3), %s256_s25, 5  ;;  %p267_p8 = scmp.lt.s32.totalorder (!%p209_p3), %s2434_s15, 2 }
   0xd   : > { %s2979_s24 = smov (%p36_p5, %s2977_s24), 0  ;;  %p274_p9 = scmp.lt.s32.totalorder (!%p209_p3), %s2438_s16, 3 }
   0xe   : > { %2961 = sst [smem:[#allocation3_spill]] %s2979_s24  ;;  %s2962_s0 = sld [smem:[#allocation4_spill]] (!%p209_p3) }
   0xf   : > { %p1931_p10 = scmp.ne.s32.totalorder (!%p209_p3), %s2434_s15, 0 }
  0x12   : > { %s2981_s17 = smov (!%p257_p6, %s2442_s17), 1  ;;  %s2983_s25 = smov (!%p259_p7, %s256_s25), 5 }
  0x13   : > { %s2315_s26 = smul.u32 84, %s2981_s17  ;;  %s1929_s9 = sshll.u32 %s2981_s17, 2  ;;  %v2460_v0 = vmov (!%p1931_p10), 0.0  }
  0x14   : > { %s2314_s27 = smul.u32 14, %s2983_s25  ;;  %s2985_s16 = smov (!%p274_p9, %s2438_s16), 3  ;;  %294 = vst [vmem:[#allocation2] sm:$0xff] (!%p1931_p10), %v2460_v0  ;;  %295 = vst [vmem:[#allocation2 + $0x8] sm:$0xff] (!%p1931_p10), %v2460_v0 }
  0x15   : > { %s268_s28 = scalar_select %p267_p8, %s2434_s15, 2 }
  0x16   : > { %s263_s29 = sadd.s32 %s2315_s26, %s2314_s27  ;;  %s2318_s13 = smul.u32 40, %s2981_s17  ;;  %296 = vst [vmem:[#allocation2 + $0x10] sm:$0xff] (!%p1931_p10), %v2460_v0  ;;  %297 = vst [vmem:[#allocation2 + $0x18] sm:$0xff] (!%p1931_p10), %v2460_v0 }
  0x17   : > { %s1926_s30 = sshll.u32 %s263_s29, 2  ;;  %s2316_s5 = smul.u32 18, %s268_s28  ;;  %298 = vst [vmem:[#allocation2 + $0x20] sm:$0xff] (!%p1931_p10), %v2460_v0  ;;  %299 = vst [vmem:[#allocation2 + $0x28] sm:$0xff] (!%p1931_p10), %v2460_v0 }
  0x18   : > { %s2543_s8 = scalar_lea.vmem %s2962_s0, %s1926_s30  ;;  %s2317_s14 = smul.u32 10, %s2985_s16  ;;  %300 = vst [vmem:[#allocation2 + $0x30] sm:$0xff] (!%p1931_p10), %v2460_v0  ;;  %301 = vst [vmem:[#allocation2 + $0x38] sm:$0xff] (!%p1931_p10), %v2460_v0 }
  0x19   : > { %s2548_s12 = scalar_lea.vmem %s2956_s1, %s2316_s5  ;;  %s286_s25 = sadd.s32 %s1929_s9, %s2985_s16  ;;  %302 = vst [vmem:[#allocation2 + $0x40] sm:$0xff] (!%p1931_p10), %v2460_v0  ;;  %303 = vst [vmem:[#allocation2 + $0x48] sm:$0xff] (!%p1931_p10), %v2460_v0 }
  0x1a   : > { %s1930_s24 = sshll.u32 %s286_s25, 1  ;;  %s278_s26 = sadd.s32 %s2318_s13, %s2317_s14 }
  0x1b   : > { %s2554_s28 = scalar_lea.vmem %s2959_s4, %s1930_s24  ;;  %s1928_s6 = sshll.u32 %s278_s26, 2 }
  0x1c   : > { %s2559_s0 = scalar_lea.vmem %s2958_s3, %s1928_s6  ;;  %293 = sbr.rel (%p1931_p10) target bundleno = 35 (0x23), region = 36 }
  0x23 PF: > { %v1932_v1 = vld [vmem:[%s2548_s12 + $0x2] sm:$0x3]  ;;  %vm407_vm0 = vcmask 1041408   ;;  %v2564_v2 = vld [vmem:[%s2543_s8 + $0x8] sm:$0xff]   ;;  %v2461_v3 = vmov 0.0   ;;  %vm2462_vm2 = vmmov 0  }
  0x24   : > { %2114 = vmatprep.subr.bf16.mxu0 %v2461_v3  ;;  %2312 = vmatprep.subr.bf16.mxu1 %v2461_v3  ;;  %v409_v4 = vsel %vm407_vm0, %v1932_v1, 0  ;;  %v304_v5 = vld [vmem:[%s2543_s8] sm:$0xf]  ;;  %v2571_v6 = vld [vmem:[%s2543_s8 + $0x4] sm:$0xf]  ;;  %v355_v8 = vshll.u32 %v2564_v2, 16 }
  0x25   : > { %2115 = vmatpush3.bf16.msra.mxu0 %v409_v4  ;;  %2313 = vmatpush3.bf16.msra.mxu1 %v409_v4  ;;  %v1933_v7 = vcombine.low %v304_v5, %v2571_v6  ;;  %vm346_vm1 = vsmask.f32 7424  ;;  %v2580_v9 = vld [vmem:[%s2543_s8 + $0x18] sm:$0xff]   ;;  %vm391_vm3 = vcmask 31744   ;;  %v2585_v12 = vld [vmem:[%s2543_s8 + $0x20] sm:$0xff]   ;;  %v2594_v22 = vld [vmem:[%s2543_s8 + $0x10] sm:$0xff]  }
  0x26   : > { %2116 = vmatprep.mubr.msk.bf16.mxu0 %vm2462_vm2, %v2461_v3  ;;  %2128 = vmatprep.mubr.msk.bf16.mxu1 %vm2462_vm2, %v2461_v3  ;;  %v371_v13 = vshll.u32 %v2580_v9, 16  ;;  %v375_v14 = vshrl.u32 %v2580_v9, 16  ;;  %v1949_v15 = vld [vmem:[%s2548_s12 + $0x4] sm:$0x3]  ;;  %v357_v17 = vrot.slane %v355_v8, 1  ;;  %v379_v20 = vshll.u32 %v2585_v12, 16 }
  0x27   : > { %2158 = vmatprep.subr.bf16.mxu0 %v2461_v3  ;;  %v348_v10 = vshrl.u32 %v1933_v7, 16  ;;  %v350_v11 = vshll.u32 %v1933_v7, 16  ;;  %2136 = vmatprep.subr.bf16.mxu1 %v2461_v3  ;;  %v314_v18 = vld [vmem:[%s2548_s12] sm:$0x3]  ;;  %v604_v21 = vsel %vm407_vm0, %v1949_v15, 0  ;;  %v359_v24 = vshrl.u32 %v2564_v2, 16 }
  0x28   : > { %v373_v19 = vrot.slane %v371_v13, 1  ;;  %v2598_v25 = vld [vmem:[%s2543_s8 + $0x28] ss:$0 sps:$4 sm:$0x11]   ;;  %v381_v27 = vrot.slane %v379_v20, 1  ;;  %v363_v28 = vshll.u32 %v2594_v22, 16 }
  0x29   : > { %v352_v16 = vrot.slane %v350_v11, 1  ;;  %v383_v29 = vshrl.u32 %v2585_v12, 16  ;;  %v495_v31 = vsel %vm407_vm0, %v314_v18, 0  ;;  %v387_v32 = vshll.u32 %v2598_v25, 16  ;;  %v570_v42 = vld [vmem:[%s2543_s8] sm:$0xe] }
  0x2a   : > { %v377_v26 = vor.u32 %v375_v14, %v373_v19  ;;  %v361_v34 = vor.u32 %v359_v24, %v357_v17  ;;  %v365_v35 = vrot.slane %v363_v28, 1  ;;  %v367_v39 = vshrl.u32 %v2594_v22, 16  ;;  %v1956_v43 = vld [vmem:[%s2548_s12 + $0x6] sm:$0x3]  ;;  %v1968_v49 = vld [vmem:[%s2548_s12 + $0x8] sm:$0x3] }
  0x2b   : > { %v353_v23 = vor.u32 %v352_v16, %v348_v10  ;;  %v385_v36 = vor.u32 %v383_v29, %v381_v27  ;;  %v389_v37 = vrot.slane %v387_v32, 1  ;;  %v1950_v45 = vcombine.low %v570_v42, %v2571_v6  ;;  %v689_v57 = vld [vmem:[%s2543_s8 + $0x4] sm:$0xe]  ;;  %v2668_v58 = vld [vmem:[%s2543_s8 + $0x8] sm:$0xf]  ;;  %v2673_v61 = vld [vmem:[%s2543_s8 + $0xc] sm:$0xff]  }
  0x2c   : > { %v382_v33 = vsel %vm346_vm1, %v377_v26, %v381_v27  ;;  %v366_v38 = vsel %vm346_vm1, %v361_v34, %v365_v35  ;;  %v369_v41 = vor.u32 %v367_v39, %v365_v35  ;;  %v757_v46 = vsel %vm407_vm0, %v1956_v43, 0  ;;  %v2690_v13 = vld [vmem:[%s2543_s8 + $0x14] sm:$0xff]   ;;  %v1982_v20 = vld [vmem:[%s2548_s12 + $0xc] sm:$0x3]  ;;  %v2708_v26 = vld [vmem:[%s2543_s8 + $0x1c] sm:$0xff]   ;;  %p2008_p11 = scmp.ne.s32.totalorder %s2434_s15, 2 }
  0x2d   : > { %v358_v30 = vsel %vm346_vm1, %v353_v23, %v357_v17  ;;  %2129 = vmatmul.mubr.msk.bf16.vlgmr.msra.gmra.mrb[0].mxu1 %vm391_vm3, %v382_v33  ;;  %v390_v40 = vsel %vm346_vm1, %v385_v36, %v389_v37  ;;  %v577_v47 = vrot.slane %v1950_v45, 1  ;;  %v578_v48 = vrot.slane %v2564_v2, 1  ;;  %v2723_v35 = vld [vmem:[%s2543_s8 + $0x24] sm:$0xff]   ;;  %v2736_v43 = vld [vmem:[%s2543_s8 + $0x2c] ss:$0 sps:$4 sm:$0x33]  }
  0x2e   : > { %2117 = vmatmul.mubr.msk.bf16.vlgmr.msra.gmra.mrb[0].mxu0 %vm391_vm3, %v358_v30  ;;  %2137 = vmatpush3.bf16.msra.mxu1 %v495_v31  ;;  %v374_v44 = vsel %vm346_vm1, %v369_v41, %v373_v19  ;;  %vm576_vm4 = vcmask 1046528   ;;  %v918_v51 = vsel %vm407_vm0, %v1968_v49, 0  ;;  %v580_v52 = vrot.slane %v2594_v22, 1  ;;  %v2391_v45 = vld [vmem:[%s2543_s8 + $0x2c] ss:$0 sps:$4 sm:$0x11]  }
  0x2f   : > { %2159 = vmatpush3.bf16.msra.mxu0 %v604_v21  ;;  %2120 = vmatprep.mubr.msk.bf16.mxu0 %vm2462_vm2, %v2461_v3  ;;  %v579_v50 = vsel %vm576_vm4, %v577_v47, %v578_v48  ;;  %v582_v54 = vrot.slane %v2580_v9, 1  ;;  %v584_v56 = vrot.slane %v2585_v12, 1  ;;  %v1957_v60 = vcombine.low %v689_v57, %v2668_v58 }
  0x30   : > { %2132 = vmatprep.mubr.msk.bf16.mxu1 %vm2462_vm2, %v2461_v3  ;;  %2180 = vmatprep.subr.bf16.mxu1 %v2461_v3  ;;  %v581_v53 = vsel %vm576_vm4, %v578_v48, %v580_v52  ;;  %v586_v62 = vrot.slane %v2598_v25, 1  ;;  %v858_v1 = vshrl.u32 %v2673_v61, 16  ;;  %v731_v5 = vrot.slane %v2673_v61, 1 }
  0x31   : > { %2202 = vmatprep.subr.bf16.mxu0 %v2461_v3  ;;  %v583_v55 = vsel %vm576_vm4, %v580_v52, %v582_v54  ;;  %v585_v59 = vsel %vm576_vm4, %v582_v54, %v584_v56  ;;  %v850_v63 = vshrl.u32 %v1957_v60, 16  ;;  %v853_v0 = vshll.u32 %v1957_v60, 16 }
  0x32   : > { %v730_v4 = vrot.slane %v1957_v60, 1  ;;  %v587_v6 = vsel %vm576_vm4, %v584_v56, %v586_v62  ;;  %v860_v10 = vrot.slane %v858_v1, 1  ;;  %v867_v17 = vshrl.u32 %v2690_v13, 16  ;;  %v1122_v60 = vld [vmem:[%s2543_s8 + $0x8] sm:$0xc]  ;;  %v2767_v1 = vld [vmem:[%s2543_s8 + $0x10] sm:$0xff]  }
  0x33   : > { %v852_v8 = vrot.slane %v850_v63, 1  ;;  %v870_v18 = vshll.u32 %v2690_v13, 16  ;;  %v733_v19 = vrot.slane %v2690_v13, 1  ;;  %vm848_vm5 = vsmask.f32 6400 }
  0x34   : > { %v1190_v25 = vsel %vm407_vm0, %v1982_v20, 0  ;;  %v876_v28 = vshrl.u32 %v2708_v26, 16  ;;  %v879_v29 = vshll.u32 %v2708_v26, 16  ;;  %v735_v30 = vrot.slane %v2708_v26, 1  ;;  %v2761_v62 = vld [vmem:[%s2543_s8 + $0xc] sm:$0xf] }
  0x35   : > { %2133 = vmatmul.mubr.msk.bf16.gmra.mrb[4].mxu1 %vm391_vm3, %v390_v40  ;;  %v872_v23 = vrot.slane %v870_v18, 2  ;;  %v734_v24 = vsel %vm576_vm4, %v731_v5, %v733_v19  ;;  %v885_v37 = vshrl.u32 %v2723_v35, 16  ;;  %v737_v39 = vrot.slane %v2723_v35, 1  ;;  %v2809_v20 = vld [vmem:[%s2543_s8 + $0x28] sm:$0xff]  }
  0x36   : > { %2121 = vmatmul.mubr.msk.bf16.gmra.mrb[4].mxu0 %vm391_vm3, %v366_v38  ;;  %2138 = vmatprep.mubr.msk.bf16.mxu1 %vm2462_vm2, %v2461_v3  ;;  %v878_v32 = vrot.slane %v876_v28, 1  ;;  %v881_v33 = vrot.slane %v879_v29, 2  ;;  %v736_v34 = vsel %vm576_vm4, %v733_v19, %v735_v30  ;;  %v888_v38 = vshll.u32 %v2723_v35, 16 }
  0x37   : > { %2124 = vmatprep.mubr.msk.bf16.mxu0 %vm2462_vm2, %v2461_v3  ;;  %v887_v41 = vrot.slane %v885_v37, 1  ;;  %v894_v47 = vshrl.u32 %v2736_v43, 16  ;;  %v897_v48 = vshll.u32 %v2736_v43, 16  ;;  %v739_v49 = vrot.slane %v2391_v45, 1 }
  0x38   : > { %v882_v36 = vor.u32 %v881_v33, %v878_v32  ;;  %v890_v42 = vrot.slane %v888_v38, 2  ;;  %vm1009_vm6 = vcmask 1045504   ;;  %v1017_v18 = vrot.slane %v2723_v35, 2 }
  0x39   : > { %v896_v52 = vrot.slane %v894_v47, 1  ;;  %v740_v54 = vsel %vm576_vm4, %v737_v39, %v739_v49  ;;  %vm1281_vm7 = vsmask.f32 5376  ;;  %v1444_v47 = vrot.slane %v2767_v1, 3 }
  0x3a   : > { %vm1442_vm8 = vcmask 1044480  }
  0x3d   : > { %2139 = vmatmul.mubr.msk.bf16.vlgmr.msra.gmra.mrb[8].mxu1 %vm391_vm3, %v1933_v7  ;;  %v1975_v7 = vld [vmem:[%s2548_s12 + $0xa] sm:$0x3] }
  0x3e   : > { %2125 = vmatmul.mubr.msk.bf16.gmra.mrb[8].mxu0 %vm391_vm3, %v374_v44  ;;  %2181 = vmatpush3.bf16.msra.mxu1 %v757_v46  ;;  %v1037_v14 = vsel %vm407_vm0, %v1975_v7, 0  ;;  %v738_v44 = vsel %vm576_vm4, %v735_v30, %v737_v39  ;;  %v891_v46 = vor.u32 %v890_v42, %v887_v41  ;;  %v2001_v7 = vld [vmem:[%s2548_s12 + $0x10] sm:$0x3] }
  0x3f   : > { %2160 = vmatprep.mubr.msk.bf16.mxu0 %vm2462_vm2, %v2461_v3  ;;  %2142 = vmatprep.mubr.msk.bf16.mxu1 %vm2462_vm2, %v2461_v3  ;;  %v2399_v30 = vld [vmem:[%s2543_s8 + $0x30] ss:$0 sps:$4 sm:$0x33]  }
  0x40   : > { %2224 = vmatprep.subr.bf16.mxu1 %v2461_v3  ;;  %v1172_v35 = vrot.slane %v2399_v30, 2 }
  0x45   : > { %2143 = vmatmul.mubr.msk.bf16.gmra.mrb[12].mxu1 %vm391_vm3, %v2564_v2  ;;  %v861_v2 = vshll.u32 %v2673_v61, 16 }
  0x46   : > { %2161 = vmatmul.mubr.msk.bf16.vlgmr.msra.gmra.mrb[12].mxu0 %vm391_vm3, %v579_v50  ;;  %2146 = vmatprep.mubr.msk.bf16.mxu1 %vm2462_vm2, %v2461_v3  ;;  %v1003_v50 = vld [vmem:[%s2543_s8 + $0x4] sm:$0xc] }
  0x47   : > { %2203 = vmatpush3.bf16.msra.mxu0 %v918_v51  ;;  %2164 = vmatprep.mubr.msk.bf16.mxu0 %vm2462_vm2, %v2461_v3  ;;  %v863_v11 = vrot.slane %v861_v2, 2  ;;  %v892_v51 = vsel %vm848_vm5, %v882_v36, %v891_v46 }
  0x48   : > { %2246 = vmatprep.subr.bf16.mxu0 %v2461_v3 }
  0x49   : > { %v864_v16 = vor.u32 %v863_v11, %v860_v10  ;;  %v1470_v11 = vsel %vm407_vm0, %v2001_v7, 0 }
  0x4d   : > { %2147 = vmatmul.mubr.msk.bf16.gmra.mrb[16].mxu1 %vm391_vm3, %v2594_v22  ;;  %v869_v22 = vrot.slane %v867_v17, 1 }
  0x4e   : > { %2165 = vmatmul.mubr.msk.bf16.gmra.mrb[16].mxu0 %vm391_vm3, %v581_v53  ;;  %2150 = vmatprep.mubr.msk.bf16.mxu1 %vm2462_vm2, %v2461_v3  ;;  %v899_v53 = vrot.slane %v897_v48, 2 }
  0x4f   : > { %2168 = vmatprep.mubr.msk.bf16.mxu0 %vm2462_vm2, %v2461_v3  ;;  %v873_v27 = vor.u32 %v872_v23, %v869_v22  ;;  %v1019_v22 = vrot.slane %v2736_v43, 2  ;;  %v1170_v23 = vrot.slane %v2809_v20, 2 }
  0x50   : > { %v900_v56 = vor.u32 %v899_v53, %v896_v52 }
  0x51   : > { %v874_v31 = vsel %vm848_vm5, %v864_v16, %v873_v27  ;;  %v883_v40 = vsel %vm848_vm5, %v873_v27, %v882_v36  ;;  %v1294_v27 = vshll.u32 %v2767_v1, 16  ;;  %v1020_v28 = vsel %vm1009_vm6, %v1017_v18, %v1019_v22 }
  0x52   : > { %v901_v63 = vsel %vm848_vm5, %v891_v46, %v900_v56  ;;  %v1173_v41 = vsel %vm1009_vm6, %v1170_v23, %v1172_v35 }
  0x55   : > { %2151 = vmatmul.mubr.msk.bf16.gmra.mrb[20].mxu1 %vm391_vm3, %v2580_v9  ;;  %v855_v9 = vrot.slane %v853_v0, 2  ;;  %v1983_v0 = vcombine.low %v1122_v60, %v2761_v62 }
  0x56   : > { %2169 = vmatmul.mubr.msk.bf16.gmra.mrb[20].mxu0 %vm391_vm3, %v583_v55  ;;  %2154 = vmatprep.mubr.msk.bf16.mxu1 %vm2462_vm2, %v2461_v3  ;;  %v1976_v55 = vcombine.low %v1003_v50, %v2668_v58  ;;  %v1994_v58 = vld [vmem:[%s2548_s12 + $0xe] sm:$0x3] }
  0x57   : > { %2172 = vmatprep.mubr.msk.bf16.mxu0 %vm2462_vm2, %v2461_v3  ;;  %v856_v15 = vor.u32 %v855_v9, %v852_v8  ;;  %v2782_v9 = vld [vmem:[%s2543_s8 + $0x18] sm:$0xff]  }
  0x58   : > { %v1010_v57 = vrot.slane %v1976_v55, 2  ;;  %v1300_v38 = vshrl.u32 %v2782_v9, 16  ;;  %v1303_v39 = vshll.u32 %v2782_v9, 16  ;;  %v1446_v55 = vrot.slane %v2782_v9, 3 }
  0x59   : > { %v865_v21 = vsel %vm848_vm5, %v856_v15, %v864_v16  ;;  %v2796_v15 = vld [vmem:[%s2543_s8 + $0x20] sm:$0xff]  }
  0x5a   : > { %v1168_v17 = vrot.slane %v2796_v15, 2  ;;  %v1305_v45 = vrot.slane %v1303_v39, 3  ;;  %v1309_v49 = vshrl.u32 %v2796_v15, 16  ;;  %v1312_v50 = vshll.u32 %v2796_v15, 16 }
  0x5b   : > { %v1447_v60 = vsel %vm1442_vm8, %v1444_v47, %v1446_v55 }
  0x5c   : > { %v1171_v29 = vsel %vm1009_vm6, %v1168_v17, %v1170_v23  ;;  %v1311_v53 = vrot.slane %v1309_v49, 2 }
  0x5d   : > { %2155 = vmatmul.mubr.msk.bf16.gmra.mrb[24].mxu1 %vm391_vm3, %v2585_v12  ;;  %v732_v12 = vsel %vm576_vm4, %v730_v4, %v731_v5  ;;  %v1351_v4 = vsel %vm407_vm0, %v1994_v58, 0  ;;  %v1164_v5 = vrot.slane %v2767_v1, 2 }
  0x5e   : > { %2173 = vmatmul.mubr.msk.bf16.gmra.mrb[24].mxu0 %vm391_vm3, %v585_v59  ;;  %2182 = vmatprep.mubr.msk.bf16.mxu1 %vm2462_vm2, %v2461_v3  ;;  %v1011_v59 = vrot.slane %v2673_v61, 2  ;;  %v1163_v61 = vrot.slane %v1983_v0, 2 }
  0x5f   : > { %2176 = vmatprep.mubr.msk.bf16.mxu0 %vm2462_vm2, %v2461_v3 }
  0x60   : > { %v1012_v2 = vsel %vm1009_vm6, %v1010_v57, %v1011_v59  ;;  %v1165_v8 = vsel %vm1009_vm6, %v1163_v61, %v1164_v5  ;;  %v1318_v57 = vshrl.u32 %v2809_v20, 16 }
  0x62   : > { %v1320_v58 = vrot.slane %v1318_v57, 2 }
  0x65   : > { %2183 = vmatmul.mubr.msk.bf16.vlgmr.msra.gmra.mrb[28].mxu1 %vm391_vm3, %v732_v12  ;;  %v1166_v12 = vrot.slane %v2782_v9, 2  ;;  %v1450_v9 = vrot.slane %v2809_v20, 3 }
  0x66   : > { %2177 = vmatmul.mubr.msk.bf16.gmra.mrb[28].mxu0 %vm391_vm3, %v587_v6  ;;  %2225 = vmatpush3.bf16.msra.mxu1 %v1037_v14  ;;  %v1013_v6 = vrot.slane %v2690_v13, 2  ;;  %v1015_v13 = vrot.slane %v2708_v26, 2  ;;  %v1291_v26 = vshrl.u32 %v2767_v1, 16  ;;  %v1448_v1 = vrot.slane %v2796_v15, 3 }
  0x67   : > { %2204 = vmatprep.mubr.msk.bf16.mxu0 %vm2462_vm2, %v2461_v3  ;;  %2186 = vmatprep.mubr.msk.bf16.mxu1 %vm2462_vm2, %v2461_v3  ;;  %v1167_v14 = vsel %vm1009_vm6, %v1164_v5, %v1166_v12  ;;  %v1169_v19 = vsel %vm1009_vm6, %v1166_v12, %v1168_v17 }
  0x68   : > { %2268 = vmatprep.subr.bf16.mxu1 %v2461_v3  ;;  %v1014_v10 = vsel %vm1009_vm6, %v1011_v59, %v1013_v6  ;;  %v1016_v16 = vsel %vm1009_vm6, %v1013_v6, %v1015_v13  ;;  %v1293_v33 = vrot.slane %v1291_v26, 2  ;;  %v1321_v59 = vshll.u32 %v2809_v20, 16 }
  0x69   : > { %v1449_v5 = vsel %vm1442_vm8, %v1446_v55, %v1448_v1 }
  0x6d   : > { %2187 = vmatmul.mubr.msk.bf16.gmra.mrb[32].mxu1 %vm391_vm3, %v734_v24  ;;  %v1283_v24 = vshrl.u32 %v1983_v0, 16 }
  0x6e   : > { %2205 = vmatmul.mubr.msk.bf16.vlgmr.msra.gmra.mrb[32].mxu0 %vm391_vm3, %v865_v21  ;;  %2190 = vmatprep.mubr.msk.bf16.mxu1 %vm2462_vm2, %v2461_v3  ;;  %v1018_v21 = vsel %vm1009_vm6, %v1015_v13, %v1017_v18 }
  0x6f   : > { %2247 = vmatpush3.bf16.msra.mxu0 %v1190_v25  ;;  %2208 = vmatprep.mubr.msk.bf16.mxu0 %vm2462_vm2, %v2461_v3  ;;  %v1286_v25 = vshll.u32 %v1983_v0, 16  ;;  %v2401_v0 = vld [vmem:[%s2543_s8 + $0x30] ss:$0 sps:$4 sm:$0x77]  }
  0x70   : > { %2290 = vmatprep.subr.bf16.mxu0 %v2461_v3  ;;  %v1330_v61 = vshll.u32 %v2401_v0, 16  ;;  %v1452_v13 = vrot.slane %v2401_v0, 3 }
  0x71   : > { %v1288_v32 = vrot.slane %v1286_v25, 3 }
  0x75   : > { %2191 = vmatmul.mubr.msk.bf16.gmra.mrb[36].mxu1 %vm391_vm3, %v736_v34  ;;  %v1296_v34 = vrot.slane %v1294_v27, 3 }
  0x76   : > { %2209 = vmatmul.mubr.msk.bf16.gmra.mrb[36].mxu0 %vm391_vm3, %v874_v31  ;;  %2194 = vmatprep.mubr.msk.bf16.mxu1 %vm2462_vm2, %v2461_v3  ;;  %v1285_v31 = vrot.slane %v1283_v24, 2 }
  0x77   : > { %2212 = vmatprep.mubr.msk.bf16.mxu0 %vm2462_vm2, %v2461_v3  ;;  %v1297_v37 = vor.u32 %v1296_v34, %v1293_v33 }
  0x78   : > { %v1289_v36 = vor.u32 %v1288_v32, %v1285_v31 }
  0x7a   : > { %v1298_v43 = vsel %vm1281_vm7, %v1289_v36, %v1297_v37 }
  0x7d   : > { %2195 = vmatmul.mubr.msk.bf16.gmra.mrb[40].mxu1 %vm391_vm3, %v738_v44  ;;  %v1302_v44 = vrot.slane %v1300_v38, 2 }
  0x7e   : > { %2213 = vmatmul.mubr.msk.bf16.gmra.mrb[40].mxu0 %vm391_vm3, %v883_v40  ;;  %2198 = vmatprep.mubr.msk.bf16.mxu1 %vm2462_vm2, %v2461_v3  ;;  %v1436_v40 = vld [vmem:[%s2543_s8 + $0x8] sm:$0x8] }
  0x7f   : > { %2216 = vmatprep.mubr.msk.bf16.mxu0 %vm2462_vm2, %v2461_v3  ;;  %v2002_v42 = vcombine.low %v1436_v40, %v2761_v62  ;;  %v1306_v48 = vor.u32 %v1305_v45, %v1302_v44 }
  0x81   : > { %v1443_v46 = vrot.slane %v2002_v42, 3  ;;  %v1307_v52 = vsel %vm1281_vm7, %v1297_v37, %v1306_v48 }
  0x85   : > { %2199 = vmatmul.mubr.msk.bf16.gmra.mrb[44].mxu1 %vm391_vm3, %v740_v54  ;;  %v1314_v54 = vrot.slane %v1312_v50, 3 }
  0x86   : > { %2217 = vmatmul.mubr.msk.bf16.gmra.mrb[44].mxu0 %vm391_vm3, %v892_v51  ;;  %2226 = vmatprep.mubr.msk.bf16.mxu1 %vm2462_vm2, %v2461_v3  ;;  %v1445_v51 = vsel %vm1442_vm8, %v1443_v46, %v1444_v47 }
  0x87   : > { %2220 = vmatprep.mubr.msk.bf16.mxu0 %vm2462_vm2, %v2461_v3  ;;  %v1315_v56 = vor.u32 %v1314_v54, %v1311_v53 }
  0x89   : > { %v1316_v62 = vsel %vm1281_vm7, %v1306_v48, %v1315_v56 }
  0x8d   : > { %2227 = vmatmul.mubr.msk.bf16.vlgmr.msra.gmra.mrb[48].mxu1 %vm391_vm3, %v1012_v2 }
  0x8e   : > { %2221 = vmatmul.mubr.msk.bf16.gmra.mrb[48].mxu0 %vm391_vm3, %v901_v63  ;;  %2269 = vmatpush3.bf16.msra.mxu1 %v1351_v4  ;;  %v1323_v63 = vrot.slane %v1321_v59, 3  ;;  %v1327_v4 = vshrl.u32 %v2401_v0, 16 }
  0x8f   : > { %2248 = vmatprep.mubr.msk.bf16.mxu0 %vm2462_vm2, %v2461_v3  ;;  %2230 = vmatprep.mubr.msk.bf16.mxu1 %vm2462_vm2, %v2461_v3 }
  0x90   : > { %v1324_v2 = vor.u32 %v1323_v63, %v1320_v58  ;;  %v1329_v7 = vrot.slane %v1327_v4, 2 }
  0x92   : > { %v1325_v6 = vsel %vm1281_vm7, %v1315_v56, %v1324_v2 }
  0x95   : > { %2231 = vmatmul.mubr.msk.bf16.gmra.mrb[52].mxu1 %vm391_vm3, %v1014_v10 }
  0x96   : > { %2249 = vmatmul.mubr.msk.bf16.vlgmr.msra.gmra.mrb[52].mxu0 %vm391_vm3, %v1165_v8  ;;  %2234 = vmatprep.mubr.msk.bf16.mxu1 %vm2462_vm2, %v2461_v3  ;;  %v1332_v8 = vrot.slane %v1330_v61, 3 }
  0x97   : > { %2291 = vmatpush3.bf16.msra.mxu0 %v1470_v11  ;;  %2252 = vmatprep.mubr.msk.bf16.mxu0 %vm2462_vm2, %v2461_v3  ;;  %v1451_v11 = vsel %vm1442_vm8, %v1448_v1, %v1450_v9 }
  0x98   : > { %v1333_v10 = vor.u32 %v1332_v8, %v1329_v7 }
  0x9a   : > { %v1334_v12 = vsel %vm1281_vm7, %v1324_v2, %v1333_v10 }
  0x9d   : > { %2235 = vmatmul.mubr.msk.bf16.gmra.mrb[56].mxu1 %vm391_vm3, %v1016_v16 }
  0x9e   : > { %2253 = vmatmul.mubr.msk.bf16.gmra.mrb[56].mxu0 %vm391_vm3, %v1167_v14  ;;  %2238 = vmatprep.mubr.msk.bf16.mxu1 %vm2462_vm2, %v2461_v3  ;;  %v1453_v14 = vsel %vm1442_vm8, %v1450_v9, %v1452_v13 }
  0x9f   : > { %2256 = vmatprep.mubr.msk.bf16.mxu0 %vm2462_vm2, %v2461_v3 }
  0xa5   : > { %2239 = vmatmul.mubr.msk.bf16.gmra.mrb[60].mxu1 %vm391_vm3, %v1018_v21 }
  0xa6   : > { %2257 = vmatmul.mubr.msk.bf16.gmra.mrb[60].mxu0 %vm391_vm3, %v1169_v19  ;;  %2242 = vmatprep.mubr.msk.bf16.mxu1 %vm2462_vm2, %v2461_v3 }
  0xa7   : > { %2260 = vmatprep.mubr.msk.bf16.mxu0 %vm2462_vm2, %v2461_v3 }
  0xad   : > { %2243 = vmatmul.mubr.msk.bf16.gmra.mrb[64].mxu1 %vm391_vm3, %v1020_v28 }
  0xae   : > { %2261 = vmatmul.mubr.msk.bf16.gmra.mrb[64].mxu0 %vm391_vm3, %v1171_v29  ;;  %2270 = vmatprep.mubr.msk.bf16.mxu1 %vm2462_vm2, %v2461_v3 }
  0xaf   : > { %2264 = vmatprep.mubr.msk.bf16.mxu0 %vm2462_vm2, %v2461_v3 }
  0xb5   : > { %2271 = vmatmul.mubr.msk.bf16.vlgmr.msra.gmra.mrb[68].mxu1 %vm391_vm3, %v1298_v43 }
  0xb6   : > { %2265 = vmatmul.mubr.msk.bf16.gmra.mrb[68].mxu0 %vm391_vm3, %v1173_v41  ;;  %2274 = vmatprep.mubr.msk.bf16.mxu1 %vm2462_vm2, %v2461_v3 }
  0xb7   : > { %2292 = vmatprep.mubr.msk.bf16.mxu0 %vm2462_vm2, %v2461_v3 }
  0xbd   : > { %2275 = vmatmul.mubr.msk.bf16.gmra.mrb[72].mxu1 %vm391_vm3, %v1307_v52 }
  0xbe   : > { %2293 = vmatmul.mubr.msk.bf16.vlgmr.msra.gmra.mrb[72].mxu0 %vm391_vm3, %v1445_v51  ;;  %2278 = vmatprep.mubr.msk.bf16.mxu1 %vm2462_vm2, %v2461_v3 }
  0xbf   : > { %2296 = vmatprep.mubr.msk.bf16.mxu0 %vm2462_vm2, %v2461_v3 }
  0xc5   : > { %2279 = vmatmul.mubr.msk.bf16.gmra.mrb[76].mxu1 %vm391_vm3, %v1316_v62 }
  0xc6   : > { %2297 = vmatmul.mubr.msk.bf16.gmra.mrb[76].mxu0 %vm391_vm3, %v1447_v60  ;;  %2282 = vmatprep.mubr.msk.bf16.mxu1 %vm2462_vm2, %v2461_v3 }
  0xc7   : > { %2300 = vmatprep.mubr.msk.bf16.mxu0 %vm2462_vm2, %v2461_v3 }
  0xcd   : > { %2283 = vmatmul.mubr.msk.bf16.gmra.mrb[80].mxu1 %vm391_vm3, %v1325_v6 }
  0xce   : > { %2301 = vmatmul.mubr.msk.bf16.gmra.mrb[80].mxu0 %vm391_vm3, %v1449_v5  ;;  %2286 = vmatprep.mubr.msk.bf16.mxu1 %vm2462_vm2, %v2461_v3 }
  0xcf   : > { %2304 = vmatprep.mubr.msk.bf16.mxu0 %vm2462_vm2, %v2461_v3 }
  0xd5   : > { %2287 = vmatmul.mubr.msk.bf16.gmra.mrb[84].mxu1 %vm391_vm3, %v1334_v12 }
  0xd6   : > { %2305 = vmatmul.mubr.msk.bf16.gmra.mrb[84].mxu0 %vm391_vm3, %v1451_v11 }
  0xd7   : > { %2308 = vmatprep.mubr.msk.bf16.mxu0 %vm2462_vm2, %v2461_v3 }
  0xde   : > { %2309 = vmatmul.mubr.msk.bf16.gmra.mrb[88].mxu0 %vm391_vm3, %v1453_v14 }
 0x100   : > { %v469_v17 = vpop.f32.mrb[0].mxu1 }
 0x101   : > { %v445_v15 = vpop.f32.mrb[0].mxu0  ;;  %v2130_v19 = vpop.f32.mrb[1].mxu1 }
 0x102   : > { %v2118_v16 = vpop.f32.mrb[1].mxu0  ;;  %v472_v21 = vpop.f32.mrb[2].mxu1 }
 0x103   : > { %v448_v18 = vpop.f32.mrb[2].mxu0  ;;  %v2131_v22 = vpop.f32.mrb[3].mxu1 }
 0x104   : > { %v2119_v20 = vpop.f32.mrb[3].mxu0 }
 0x108   : > { %v477_v25 = vpop.f32.mrb[4].mxu1 }
 0x109   : > { %v453_v23 = vpop.f32.mrb[4].mxu0  ;;  %v2134_v27 = vpop.f32.mrb[5].mxu1 }
 0x10a   : > { %v2122_v24 = vpop.f32.mrb[5].mxu0  ;;  %v480_v3 = vpop.f32.mrb[6].mxu1 }
 0x10b   : > { %v456_v26 = vpop.f32.mrb[6].mxu0  ;;  %v2135_v29 = vpop.f32.mrb[7].mxu1 }
 0x10c   : > { %v2123_v28 = vpop.f32.mrb[7].mxu0 }
 0x110   : > { %v531_v31 = vpop.f32.mrb[8].mxu1 }
 0x111   : > { %v461_v30 = vpop.f32.mrb[8].mxu0  ;;  %v532_v33 = vadd.f32 %v531_v31, %v445_v15  ;;  %v2140_v34 = vpop.f32.mrb[9].mxu1 }
 0x112   : > { %v2126_v32 = vpop.f32.mrb[9].mxu0  ;;  %v534_v36 = vpop.f32.mrb[10].mxu1 }
 0x113   : > { %v464_v35 = vpop.f32.mrb[10].mxu0  ;;  %v535_v38 = vadd.f32 %v534_v36, %v448_v18  ;;  %v2141_v39 = vpop.f32.mrb[11].mxu1 }
 0x114   : > { %v2127_v37 = vpop.f32.mrb[11].mxu0 }
 0x118   : > { %v539_v41 = vpop.f32.mrb[12].mxu1 }
 0x119   : > { %v640_v40 = vpop.f32.mrb[12].mxu0  ;;  %v540_v44 = vadd.f32 %v539_v41, %v453_v23  ;;  %v2144_v45 = vpop.f32.mrb[13].mxu1 }
 0x11a   : > { %v679_v42 = vadd.f32 %v640_v40, %v532_v33  ;;  %v2162_v43 = vpop.f32.mrb[13].mxu0  ;;  %v542_v47 = vpop.f32.mrb[14].mxu1 }
 0x11b   : > { %v643_v46 = vpop.f32.mrb[14].mxu0  ;;  %v543_v50 = vadd.f32 %v542_v47, %v456_v26  ;;  %v2145_v51 = vpop.f32.mrb[15].mxu1 }
 0x11c   : > { %v680_v48 = vadd.f32 %v643_v46, %v535_v38  ;;  %v2163_v49 = vpop.f32.mrb[15].mxu0 }
 0x120   : > { %v547_v53 = vpop.f32.mrb[16].mxu1 }
 0x121   : > { %v648_v52 = vpop.f32.mrb[16].mxu0  ;;  %v548_v56 = vadd.f32 %v547_v53, %v461_v30  ;;  %v2148_v57 = vpop.f32.mrb[17].mxu1 }
 0x122   : > { %v681_v54 = vadd.f32 %v648_v52, %v540_v44  ;;  %v2166_v55 = vpop.f32.mrb[17].mxu0  ;;  %v550_v60 = vpop.f32.mrb[18].mxu1 }
 0x123   : > { %v651_v59 = vpop.f32.mrb[18].mxu0  ;;  %v551_v63 = vadd.f32 %v550_v60, %v464_v35  ;;  %v2149_v0 = vpop.f32.mrb[19].mxu1 }
 0x124   : > { %v682_v62 = vadd.f32 %v651_v59, %v543_v50  ;;  %v2167_v58 = vpop.f32.mrb[19].mxu0 }
 0x128   : > { %v555_v2 = vpop.f32.mrb[20].mxu1 }
 0x129   : > { %v656_v1 = vpop.f32.mrb[20].mxu0  ;;  %v556_v5 = vadd.f32 %v555_v2, %v469_v17  ;;  %v2152_v6 = vpop.f32.mrb[21].mxu1 }
 0x12a   : > { %v683_v4 = vadd.f32 %v656_v1, %v548_v56  ;;  %v2170_v61 = vpop.f32.mrb[21].mxu0  ;;  %v558_v8 = vpop.f32.mrb[22].mxu1 }
 0x12b   : > { %v659_v7 = vpop.f32.mrb[22].mxu0  ;;  %v559_v11 = vadd.f32 %v558_v8, %v472_v21  ;;  %v2153_v12 = vpop.f32.mrb[23].mxu1 }
 0x12c   : > { %v684_v9 = vadd.f32 %v659_v7, %v551_v63  ;;  %v2171_v10 = vpop.f32.mrb[23].mxu0 }
 0x130   : > { %v563_v14 = vpop.f32.mrb[24].mxu1 }
 0x131   : > { %v664_v13 = vpop.f32.mrb[24].mxu0  ;;  %v564_v18 = vadd.f32 %v563_v14, %v477_v25  ;;  %v2156_v19 = vpop.f32.mrb[25].mxu1 }
 0x132   : > { %v685_v15 = vadd.f32 %v664_v13, %v556_v5  ;;  %v2174_v16 = vpop.f32.mrb[25].mxu0  ;;  %v566_v22 = vpop.f32.mrb[26].mxu1 }
 0x133   : > { %v667_v20 = vpop.f32.mrb[26].mxu0  ;;  %v567_v26 = vadd.f32 %v566_v22, %v480_v3  ;;  %v2157_v27 = vpop.f32.mrb[27].mxu1 }
 0x134   : > { %v686_v23 = vadd.f32 %v667_v20, %v559_v11  ;;  %v2175_v24 = vpop.f32.mrb[27].mxu0 }
 0x138   : > { %v793_v29 = vpop.f32.mrb[28].mxu1 }
 0x139   : > { %v672_v17 = vpop.f32.mrb[28].mxu0  ;;  %v832_v31 = vadd.f32 %v793_v29, %v679_v42  ;;  %v2184_v32 = vpop.f32.mrb[29].mxu1 }
 0x13a   : > { %v687_v28 = vadd.f32 %v672_v17, %v564_v18  ;;  %v2178_v30 = vpop.f32.mrb[29].mxu0  ;;  %v796_v34 = vpop.f32.mrb[30].mxu1 }
 0x13b   : > { %v675_v21 = vpop.f32.mrb[30].mxu0  ;;  %v833_v36 = vadd.f32 %v796_v34, %v680_v48  ;;  %v2185_v37 = vpop.f32.mrb[31].mxu1 }
 0x13c   : > { %v688_v33 = vadd.f32 %v675_v21, %v567_v26  ;;  %v2179_v35 = vpop.f32.mrb[31].mxu0 }
 0x140   : > { %v801_v38 = vpop.f32.mrb[32].mxu1 }
 0x141   : > { %v954_v25 = vpop.f32.mrb[32].mxu0  ;;  %v834_v41 = vadd.f32 %v801_v38, %v681_v54  ;;  %v2188_v43 = vpop.f32.mrb[33].mxu1 }
 0x142   : > { %v993_v39 = vadd.f32 %v954_v25, %v832_v31  ;;  %v2206_v40 = vpop.f32.mrb[33].mxu0  ;;  %v804_v44 = vpop.f32.mrb[34].mxu1 }
 0x143   : > { %v957_v3 = vpop.f32.mrb[34].mxu0  ;;  %v835_v47 = vadd.f32 %v804_v44, %v682_v62  ;;  %v2189_v49 = vpop.f32.mrb[35].mxu1 }
 0x144   : > { %v994_v45 = vadd.f32 %v957_v3, %v833_v36  ;;  %v2207_v46 = vpop.f32.mrb[35].mxu0 }
 0x148   : > { %v809_v50 = vpop.f32.mrb[36].mxu1 }
 0x149   : > { %v962_v42 = vpop.f32.mrb[36].mxu0  ;;  %v836_v53 = vadd.f32 %v809_v50, %v683_v4  ;;  %v2192_v55 = vpop.f32.mrb[37].mxu1 }
 0x14a   : > { %v995_v51 = vadd.f32 %v962_v42, %v834_v41  ;;  %v2210_v52 = vpop.f32.mrb[37].mxu0  ;;  %v812_v56 = vpop.f32.mrb[38].mxu1 }
 0x14b   : > { %v965_v48 = vpop.f32.mrb[38].mxu0  ;;  %v837_v60 = vadd.f32 %v812_v56, %v684_v9  ;;  %v2193_v58 = vpop.f32.mrb[39].mxu1 }
 0x14c   : > { %v996_v57 = vadd.f32 %v965_v48, %v835_v47  ;;  %v2211_v59 = vpop.f32.mrb[39].mxu0 }
 0x150   : > { %v817_v63 = vpop.f32.mrb[40].mxu1 }
 0x151   : > { %v970_v54 = vpop.f32.mrb[40].mxu0  ;;  %v838_v2 = vadd.f32 %v817_v63, %v685_v15  ;;  %v2196_v61 = vpop.f32.mrb[41].mxu1 }
 0x152   : > { %v997_v0 = vadd.f32 %v970_v54, %v836_v53  ;;  %v2214_v1 = vpop.f32.mrb[41].mxu0  ;;  %v820_v5 = vpop.f32.mrb[42].mxu1 }
 0x153   : > { %v973_v62 = vpop.f32.mrb[42].mxu0  ;;  %v839_v8 = vadd.f32 %v820_v5, %v686_v23  ;;  %v2197_v10 = vpop.f32.mrb[43].mxu1 }
 0x154   : > { %v998_v6 = vadd.f32 %v973_v62, %v837_v60  ;;  %v2215_v7 = vpop.f32.mrb[43].mxu0 }
 0x158   : > { %v825_v11 = vpop.f32.mrb[44].mxu1 }
 0x159   : > { %v978_v4 = vpop.f32.mrb[44].mxu0  ;;  %v840_v14 = vadd.f32 %v825_v11, %v687_v28  ;;  %v2200_v16 = vpop.f32.mrb[45].mxu1 }
 0x15a   : > { %v999_v12 = vadd.f32 %v978_v4, %v838_v2  ;;  %v2218_v13 = vpop.f32.mrb[45].mxu0  ;;  %v828_v18 = vpop.f32.mrb[46].mxu1 }
 0x15b   : > { %v981_v9 = vpop.f32.mrb[46].mxu0  ;;  %v841_v22 = vadd.f32 %v828_v18, %v688_v33  ;;  %v2201_v24 = vpop.f32.mrb[47].mxu1 }
 0x15c   : > { %v1000_v19 = vadd.f32 %v981_v9, %v839_v8  ;;  %v2219_v20 = vpop.f32.mrb[47].mxu0 }
 0x160   : > { %v1073_v27 = vpop.f32.mrb[48].mxu1 }
 0x161   : > { %v986_v15 = vpop.f32.mrb[48].mxu0  ;;  %v1112_v29 = vadd.f32 %v1073_v27, %v993_v39  ;;  %v2228_v30 = vpop.f32.mrb[49].mxu1 }
 0x162   : > { %v1001_v26 = vadd.f32 %v986_v15, %v840_v14  ;;  %v2222_v17 = vpop.f32.mrb[49].mxu0  ;;  %v1076_v32 = vpop.f32.mrb[50].mxu1 }
 0x163   : > { %v989_v23 = vpop.f32.mrb[50].mxu0  ;;  %v1113_v34 = vadd.f32 %v1076_v32, %v994_v45  ;;  %v2229_v35 = vpop.f32.mrb[51].mxu1 }
 0x164   : > { %v1002_v31 = vadd.f32 %v989_v23, %v841_v22  ;;  %v2223_v21 = vpop.f32.mrb[51].mxu0 }
 0x168   : > { %v1081_v36 = vpop.f32.mrb[52].mxu1 }
 0x169   : > { %v1226_v28 = vpop.f32.mrb[52].mxu0  ;;  %v1114_v38 = vadd.f32 %v1081_v36, %v995_v51  ;;  %v2232_v40 = vpop.f32.mrb[53].mxu1 }
 0x16a   : > { %v1265_v37 = vadd.f32 %v1226_v28, %v1112_v29  ;;  %v2250_v25 = vpop.f32.mrb[53].mxu0  ;;  %v1084_v41 = vpop.f32.mrb[54].mxu1  ;;  %v1556_v40 = vld [vmem:[#allocation2 + $0x8] sm:$0xff] }
 0x16b   : > { %v1229_v33 = vpop.f32.mrb[54].mxu0  ;;  %v1115_v44 = vadd.f32 %v1084_v41, %v996_v57  ;;  %v2233_v46 = vpop.f32.mrb[55].mxu1 }
 0x16c   : > { %v1266_v43 = vadd.f32 %v1229_v33, %v1113_v34  ;;  %v2251_v3 = vpop.f32.mrb[55].mxu0  ;;  %v1555_v34 = vld [vmem:[#allocation2] sm:$0xff] }
 0x170   : > { %v1089_v47 = vpop.f32.mrb[56].mxu1 }
 0x171   : > { %v1234_v39 = vpop.f32.mrb[56].mxu0  ;;  %v1116_v50 = vadd.f32 %v1089_v47, %v997_v0  ;;  %v2236_v52 = vpop.f32.mrb[57].mxu1  ;;  %v1557_v47 = vld [vmem:[#allocation2 + $0x10] sm:$0xff] }
 0x172   : > { %v1267_v49 = vadd.f32 %v1234_v39, %v1114_v38  ;;  %v2254_v42 = vpop.f32.mrb[57].mxu0  ;;  %v1092_v53 = vpop.f32.mrb[58].mxu1 }
 0x173   : > { %v1237_v45 = vpop.f32.mrb[58].mxu0  ;;  %v1117_v56 = vadd.f32 %v1092_v53, %v998_v6  ;;  %v2237_v59 = vpop.f32.mrb[59].mxu1 }
 0x174   : > { %v1268_v55 = vadd.f32 %v1237_v45, %v1115_v44  ;;  %v2255_v48 = vpop.f32.mrb[59].mxu0 }
 0x175   : > { %v1558_v48 = vld [vmem:[#allocation2 + $0x18] sm:$0xff] }
 0x178   : > { %v1097_v60 = vpop.f32.mrb[60].mxu1 }
 0x179   : > { %v1242_v51 = vpop.f32.mrb[60].mxu0  ;;  %v1118_v63 = vadd.f32 %v1097_v60, %v999_v12  ;;  %v2240_v1 = vpop.f32.mrb[61].mxu1 }
 0x17a   : > { %v1269_v58 = vadd.f32 %v1242_v51, %v1116_v50  ;;  %v2258_v54 = vpop.f32.mrb[61].mxu0  ;;  %v1100_v2 = vpop.f32.mrb[62].mxu1 }
 0x17b   : > { %v1245_v57 = vpop.f32.mrb[62].mxu0  ;;  %v1119_v5 = vadd.f32 %v1100_v2, %v1000_v19  ;;  %v2241_v7 = vpop.f32.mrb[63].mxu1 }
 0x17c   : > { %v1270_v61 = vadd.f32 %v1245_v57, %v1117_v56  ;;  %v2259_v62 = vpop.f32.mrb[63].mxu0  ;;  %v1559_v57 = vld [vmem:[#allocation2 + $0x20] sm:$0xff] }
 0x180   : > { %v1105_v8 = vpop.f32.mrb[64].mxu1 }
 0x181   : > { %v1250_v0 = vpop.f32.mrb[64].mxu0  ;;  %v1120_v11 = vadd.f32 %v1105_v8, %v1001_v26  ;;  %v2244_v6 = vpop.f32.mrb[65].mxu1  ;;  %v1560_v8 = vld [vmem:[#allocation2 + $0x28] sm:$0xff] }
 0x182   : > { %v2884_v10 = vadd.f32 %v1250_v0, %v1118_v63  ;;  %v2262_v4 = vpop.f32.mrb[65].mxu0  ;;  %v1108_v14 = vpop.f32.mrb[66].mxu1 }
 0x183   : > { %v1253_v13 = vpop.f32.mrb[66].mxu0  ;;  %v1121_v12 = vadd.f32 %v1108_v14, %v1002_v31  ;;  %v2245_v18 = vpop.f32.mrb[67].mxu1 }
 0x184   : > { %v2886_v16 = vadd.f32 %v1253_v13, %v1119_v5  ;;  %v2263_v9 = vpop.f32.mrb[67].mxu0  ;;  %v1561_v18 = vld [vmem:[#allocation2 + $0x30] sm:$0xff] }
 0x188   : > { %v1387_v24 = vpop.f32.mrb[68].mxu1 }
 0x189   : > { %v1258_v20 = vpop.f32.mrb[68].mxu0  ;;  %v1426_v15 = vadd.f32 %v1387_v24, %v1265_v37  ;;  %v2272_v27 = vpop.f32.mrb[69].mxu1 }
 0x18a   : > { %v2888_v22 = vadd.f32 %v1258_v20, %v1120_v11  ;;  %v2266_v19 = vpop.f32.mrb[69].mxu0  ;;  %v1390_v30 = vpop.f32.mrb[70].mxu1 }
 0x18b   : > { %v1261_v17 = vpop.f32.mrb[70].mxu0  ;;  %v1427_v23 = vadd.f32 %v1390_v30, %v1266_v43  ;;  %v2273_v32 = vpop.f32.mrb[71].mxu1 }
 0x18c   : > { %v2890_v29 = vadd.f32 %v1261_v17, %v1121_v12  ;;  %v2267_v26 = vpop.f32.mrb[71].mxu0  ;;  %v1562_v17 = vld [vmem:[#allocation2 + $0x38] sm:$0xff] }
 0x190   : > { %v1395_v35 = vpop.f32.mrb[72].mxu1 }
 0x191   : > { %v1506_v21 = vpop.f32.mrb[72].mxu0  ;;  %v1428_v36 = vadd.f32 %v1395_v35, %v1267_v49  ;;  %v2276_v25 = vpop.f32.mrb[73].mxu1 }
 0x192   : > { %v1545_v28 = vadd.f32 %v1506_v21, %v1426_v15  ;;  %v2294_v31 = vpop.f32.mrb[73].mxu0  ;;  %v1398_v41 = vpop.f32.mrb[74].mxu1 }
 0x193   : > { %v1509_v38 = vpop.f32.mrb[74].mxu0  ;;  %v1429_v44 = vadd.f32 %v1398_v41, %v1268_v55  ;;  %v2277_v46 = vpop.f32.mrb[75].mxu1 }
 0x194   : > { %v1565_v33 = vadd.f32 %v1555_v34, %v1545_v28  ;;  %v1546_v37 = vadd.f32 %v1509_v38, %v1427_v23  ;;  %v2295_v3 = vpop.f32.mrb[75].mxu0  ;;  %v1563_v28 = vld [vmem:[#allocation2 + $0x40] sm:$0xff]  ;;  %v1564_v38 = vld [vmem:[#allocation2 + $0x48] sm:$0xff] }
 0x195   : > { %v2463_v3 = vmov (!%p2008_p11), 0   ;;  %v1650_v46 = vld [vmem:[%s2957_s2 + $0x8] sm:$0xff] (!%p2008_p11) }
 0x196   : > { %1575 = vst [vmem:[#allocation2] sm:$0xff] %v1565_v33  ;;  %v1566_v39 = vadd.f32 %v1556_v40, %v1546_v37  ;;  %v1649_v37 = vld [vmem:[%s2957_s2] sm:$0xff] (!%p2008_p11)  ;;  %2403 = vset.pattern.permute.xlu1 (!%p2008_p11), %v2463_v3  ;;  %2402 = vset.pattern.permute.xlu0 (!%p2008_p11), %v2463_v3 }
 0x197   : > { %1661 = vperm.xlu0 (!%p2008_p11), %2402, %v1649_v37  }
 0x198   : > { %1576 = vst [vmem:[#allocation2 + $0x8] sm:$0xff] %v1566_v39  ;;  %v1403_v42 = vpop.f32.mrb[76].mxu1 }
 0x199   : > { %v1514_v43 = vpop.f32.mrb[76].mxu0  ;;  %v1430_v45 = vadd.f32 %v1403_v42, %v1269_v58  ;;  %v2280_v53 = vpop.f32.mrb[77].mxu1 }
 0x19a   : > { %v1547_v50 = vadd.f32 %v1514_v43, %v1428_v36  ;;  %v2298_v52 = vpop.f32.mrb[77].mxu0  ;;  %v1406_v59 = vpop.f32.mrb[78].mxu1 }
 0x19b   : > { %v1517_v49 = vpop.f32.mrb[78].mxu0  ;;  %v1431_v54 = vadd.f32 %v1406_v59, %v1270_v61  ;;  %v2281_v63 = vpop.f32.mrb[79].mxu1  ;;  %1666 = vperm.xlu0 (!%p2008_p11), %2402, %v1650_v46  }
 0x19c   : > { %v1567_v56 = vadd.f32 %v1557_v47, %v1547_v50  ;;  %v1548_v51 = vadd.f32 %v1517_v49, %v1429_v44  ;;  %v2299_v60 = vpop.f32.mrb[79].mxu0  ;;  %v1652_v44 = vld [vmem:[%s2957_s2 + $0x18] sm:$0xff] (!%p2008_p11)  ;;  %v1654_v47 = vld [vmem:[%s2957_s2 + $0x28] sm:$0xff] (!%p2008_p11)  ;;  %v1653_v50 = vld [vmem:[%s2957_s2 + $0x20] sm:$0xff] (!%p2008_p11) }
 0x19d   : > { %v1589_v52 = vld [vmem:[#allocation2] sm:$0xff] (!%p2008_p11)  ;;  %v1656_v49 = vld [vmem:[%s2957_s2 + $0x38] sm:$0xff] (!%p2008_p11)  ;;  %v1658_v60 = vld [vmem:[%s2957_s2 + $0x48] sm:$0xff] (!%p2008_p11) }
 0x19e   : > { %1577 = vst [vmem:[#allocation2 + $0x10] sm:$0xff] %v1567_v56  ;;  %v1568_v55 = vadd.f32 %v1558_v48, %v1548_v51  ;;  %v1655_v48 = vld [vmem:[%s2957_s2 + $0x30] sm:$0xff] (!%p2008_p11) }
 0x19f   : > { %1681 = vperm.xlu0 (!%p2008_p11), %2402, %v1653_v50  }
 0x1a0   : > { %1578 = vst [vmem:[#allocation2 + $0x18] sm:$0xff] %v1568_v55  ;;  %v1411_v2 = vpop.f32.mrb[80].mxu1 }
 0x1a1   : > { %v1522_v1 = vpop.f32.mrb[80].mxu0  ;;  %v1432_v7 = vadd.f32 %v1411_v2, %v2884_v10  ;;  %v2284_v58 = vpop.f32.mrb[81].mxu1 }
 0x1a2   : > { %v1549_v62 = vadd.f32 %v1522_v1, %v1430_v45  ;;  %v2302_v5 = vpop.f32.mrb[81].mxu0  ;;  %v1414_v11 = vpop.f32.mrb[82].mxu1  ;;  %v1590_v45 = vld [vmem:[#allocation2 + $0x8] sm:$0xff] (!%p2008_p11) }
 0x1a3   : > { %v1525_v0 = vpop.f32.mrb[82].mxu0  ;;  %v1433_v61 = vadd.f32 %v1414_v11, %v2886_v16  ;;  %v2285_v14 = vpop.f32.mrb[83].mxu1  ;;  %v2034_v53 = vpack.c.bf16 (!%p2008_p11), %v1590_v45, %v1589_v52  ;;  %1691 = vperm.xlu0 (!%p2008_p11), %2402, %v1655_v48  }
 0x1a4   : > { %v1569_v4 = vadd.f32 %v1559_v57, %v1549_v62  ;;  %v1550_v6 = vadd.f32 %v1525_v0, %v1431_v54  ;;  %v2303_v13 = vpop.f32.mrb[83].mxu0  ;;  %v1657_v54 = vld [vmem:[%s2957_s2 + $0x40] sm:$0xff] (!%p2008_p11) }
 0x1a5   : > { %v1591_v39 = vld [vmem:[#allocation2 + $0x10] sm:$0xff] (!%p2008_p11)  ;;  %2035 = vst [vmem:[%s2559_s0] sm:$0xff] (!%p2008_p11), %v2034_v53  }
 0x1a6   : > { %1579 = vst [vmem:[#allocation2 + $0x20] sm:$0xff] %v1569_v4  ;;  %v1570_v9 = vadd.f32 %v1560_v8, %v1550_v6 }
 0x1a7   : > { %v1592_v43 = vld [vmem:[#allocation2 + $0x18] sm:$0xff] (!%p2008_p11)  ;;  %1701 = vperm.xlu0 (!%p2008_p11), %2402, %v1657_v54  }
 0x1a8   : > { %1580 = vst [vmem:[#allocation2 + $0x28] sm:$0xff] %v1570_v9  ;;  %v1419_v20 = vpop.f32.mrb[84].mxu1  ;;  %v2039_v42 = vpack.c.bf16 (!%p2008_p11), %v1592_v43, %v1591_v39 }
 0x1a9   : > { %v1530_v12 = vpop.f32.mrb[84].mxu0  ;;  %v1434_v10 = vadd.f32 %v1419_v20, %v2888_v22  ;;  %v2288_v15 = vpop.f32.mrb[85].mxu1 }
 0x1aa   : > { %v1551_v24 = vadd.f32 %v1530_v12, %v1432_v7  ;;  %v2306_v19 = vpop.f32.mrb[85].mxu0  ;;  %v1422_v26 = vpop.f32.mrb[86].mxu1  ;;  %2056 = vst [vmem:[%s2559_s0 + $0x8] sm:$0xff] (!%p2008_p11), %v2039_v42  }
 0x1ab   : > { %v1533_v27 = vpop.f32.mrb[86].mxu0  ;;  %v1435_v16 = vadd.f32 %v1422_v26, %v2890_v29  ;;  %v2289_v21 = vpop.f32.mrb[87].mxu1  ;;  %v1651_v29 = vld [vmem:[%s2957_s2 + $0x10] sm:$0xff] (!%p2008_p11) }
 0x1ac   : > { %v1571_v30 = vadd.f32 %v1561_v18, %v1551_v24  ;;  %v1552_v23 = vadd.f32 %v1533_v27, %v1433_v61  ;;  %v2307_v32 = vpop.f32.mrb[87].mxu0  ;;  %1671 = vperm.xlu1 (!%p2008_p11), %2403, %v1651_v29  }
 0x1ad   : > { %v1593_v59 = vld [vmem:[#allocation2 + $0x20] sm:$0xff] (!%p2008_p11) }
 0x1ae   : > { %1581 = vst [vmem:[#allocation2 + $0x30] sm:$0xff] %v1571_v30  ;;  %v1572_v34 = vadd.f32 %v1562_v17, %v1552_v23 }
 0x1af   : > { %v1594_v56 = vld [vmem:[#allocation2 + $0x28] sm:$0xff] (!%p2008_p11) }
 0x1b0   : > { %1582 = vst [vmem:[#allocation2 + $0x38] sm:$0xff] %v1572_v34  ;;  %1676 = vperm.xlu1 (!%p2008_p11), %2403, %v1652_v44   ;;  %v2044_v51 = vpack.c.bf16 (!%p2008_p11), %v1594_v56, %v1593_v59 }
 0x1b1   : > { %v1538_v35 = vpop.f32.mrb[88].mxu0 }
 0x1b2   : > { %v1553_v31 = vadd.f32 %v1538_v35, %v1434_v10  ;;  %v2310_v36 = vpop.f32.mrb[89].mxu0  ;;  %1588 = sbr.rel (%p2008_p11) target bundleno = 591 (0x24f), region = 40  ;;  %2057 = vst [vmem:[%s2559_s0 + $0x10] sm:$0xff] (!%p2008_p11), %v2044_v51  }
 0x1b3   : > { %v1541_v25 = vpop.f32.mrb[90].mxu0 }
 0x1b4   : > { %v1573_v22 = vadd.f32 %v1563_v28, %v1553_v31  ;;  %v1554_v40 = vadd.f32 %v1541_v25, %v1435_v16  ;;  %v2311_v33 = vpop.f32.mrb[91].mxu0  ;;  %1686 = vperm.xlu1 (!%p2008_p11), %2403, %v1654_v47  }
 0x1b5   : > { %v1595_v55 = vld [vmem:[#allocation2 + $0x30] sm:$0xff] (!%p2008_p11) }
 0x1b6   : > { %1583 = vst [vmem:[#allocation2 + $0x40] sm:$0xff] %v1573_v22  ;;  %v1574_v41 = vadd.f32 %v1564_v38, %v1554_v40 }
 0x1b7   : > { %v1596_v63 = vld [vmem:[#allocation2 + $0x38] sm:$0xff] (!%p2008_p11) }
 0x1b8   : > { %1584 = vst [vmem:[#allocation2 + $0x48] sm:$0xff] %v1574_v41  ;;  %1696 = vperm.xlu1 (!%p2008_p11), %2403, %v1656_v49   ;;  %v2049_v1 = vpack.c.bf16 (!%p2008_p11), %v1596_v63, %v1595_v55 }
 0x1ba   : > { %2058 = vst [vmem:[%s2559_s0 + $0x18] sm:$0xff] %v2049_v1  }
 0x1bc   : > { %1706 = vperm.xlu1 %2403, %v1658_v60  }
 0x1bd   : > { %v1597_v2 = vld [vmem:[#allocation2 + $0x40] sm:$0xff] }
 0x1bf   : > { %v1598_v57 = vld [vmem:[#allocation2 + $0x48] sm:$0xff] }
 0x1c0   : > { %v2054_v62 = vpack.c.bf16 %v1598_v57, %v1597_v2 }
 0x1c2   : > { %2059 = vst [vmem:[%s2559_s0 + $0x20] sm:$0xff] %v2054_v62  }
 0x216   : > { %v1662_v7 = vpop.permute.xlu0 %1661 }
 0x217   : > { %v1709_v58 = vmul.f32 %v1662_v7, %v1589_v52 }
 0x219   : > { %v1735_v6 = vmul.f32 %v1709_v58, %v1589_v52 }
 0x21a   : > { %v1667_v8 = vpop.permute.xlu0 %1666 }
 0x21b   : > { %v1710_v11 = vmul.f32 %v1667_v8, %v1590_v45 }
 0x21d   : > { %v1719_v61 = vadd.f32 %v1710_v11, %v1709_v58  ;;  %v1736_v14 = vmul.f32 %v1710_v11, %v1590_v45 }
 0x21e   : > { %v1682_v12 = vpop.permute.xlu0 %1681 }
 0x21f   : > { %v1745_v24 = vadd.f32 %v1736_v14, %v1735_v6  ;;  %v1713_v19 = vmul.f32 %v1682_v12, %v1593_v59 }
 0x221   : > { %v1739_v32 = vmul.f32 %v1713_v19, %v1593_v59 }
 0x222   : > { %v1692_v26 = vpop.permute.xlu0 %1691 }
 0x223   : > { %v1715_v21 = vmul.f32 %v1692_v26, %v1595_v55 }
 0x225   : > { %v1741_v22 = vmul.f32 %v1715_v21, %v1595_v55 }
 0x226   : > { %v1702_v25 = vpop.permute.xlu0 %1701 }
 0x227   : > { %v1717_v33 = vmul.f32 %v1702_v25, %v1597_v2 }
 0x229   : > { %v1743_v46 = vmul.f32 %v1717_v33, %v1597_v2 }
 0x22b   : > { %v1672_v5 = vpop.permute.xlu1 %1671 }
 0x22c   : > { %v1711_v4 = vmul.f32 %v1672_v5, %v1591_v39 }
 0x22e   : > { %v1737_v18 = vmul.f32 %v1711_v4, %v1591_v39  ;;  %v1720_v20 = vadd.f32 %v1719_v61, %v1711_v4 }
 0x22f   : > { %v1677_v0 = vpop.permute.xlu1 %1676 }
 0x230   : > { %v1712_v13 = vmul.f32 %v1677_v0, %v1592_v43  ;;  %v1746_v15 = vadd.f32 %v1745_v24, %v1737_v18 }
 0x232   : > { %v1738_v10 = vmul.f32 %v1712_v13, %v1592_v43  ;;  %v1721_v17 = vadd.f32 %v1720_v20, %v1712_v13 }
 0x233   : > { %v1687_v9 = vpop.permute.xlu1 %1686 }
 0x234   : > { %v1714_v27 = vmul.f32 %v1687_v9, %v1594_v56  ;;  %v1722_v23 = vadd.f32 %v1721_v17, %v1713_v19  ;;  %v1747_v16 = vadd.f32 %v1746_v15, %v1738_v10 }
 0x236   : > { %v1740_v34 = vmul.f32 %v1714_v27, %v1594_v56  ;;  %v1748_v35 = vadd.f32 %v1747_v16, %v1739_v32  ;;  %v1723_v31 = vadd.f32 %v1722_v23, %v1714_v27 }
 0x237   : > { %v1697_v30 = vpop.permute.xlu1 %1696 }
 0x238   : > { %v1716_v28 = vmul.f32 %v1697_v30, %v1596_v63  ;;  %v1724_v38 = vadd.f32 %v1723_v31, %v1715_v21  ;;  %v1749_v40 = vadd.f32 %v1748_v35, %v1740_v34 }
 0x23a   : > { %v1742_v41 = vmul.f32 %v1716_v28, %v1596_v63  ;;  %v1750_v29 = vadd.f32 %v1749_v40, %v1741_v22  ;;  %v1725_v3 = vadd.f32 %v1724_v38, %v1716_v28 }
 0x23b   : > { %v1707_v36 = vpop.permute.xlu1 %1706 }
 0x23c   : > { %v1718_v37 = vmul.f32 %v1707_v36, %v1598_v57  ;;  %v1726_v44 = vadd.f32 %v1725_v3, %v1717_v33  ;;  %v1751_v39 = vadd.f32 %v1750_v29, %v1742_v41 }
 0x23e   : > { %v1744_v43 = vmul.f32 %v1718_v37, %v1598_v57  ;;  %v1727_v47 = vadd.f32 %v1726_v44, %v1718_v37  ;;  %v1752_v42 = vadd.f32 %v1751_v39, %v1743_v46 }
 0x240   : > { %v1728_v50 = vrot.slane %v1727_v47, 4  ;;  %v1753_v52 = vadd.f32 %v1752_v42, %v1744_v43 }
 0x242   : > { %v1729_v45 = vadd.f32 %v1728_v50, %v1727_v47  ;;  %v1754_v53 = vrot.slane %v1753_v52, 4 }
 0x244   : > { %v1730_v49 = vrot.slane %v1729_v45, 2  ;;  %v1755_v48 = vadd.f32 %v1754_v53, %v1753_v52 }
 0x246   : > { %v1731_v56 = vadd.f32 %v1730_v49, %v1729_v45  ;;  %v1756_v59 = vrot.slane %v1755_v48, 2 }
 0x248   : > { %v1732_v51 = vrot.slane %v1731_v56, 1  ;;  %v1757_v60 = vadd.f32 %v1756_v59, %v1755_v48 }
 0x24a   : > { %v1733_v54 = vadd.f32 %v1732_v51, %v1731_v56  ;;  %v1758_v63 = vrot.slane %v1757_v60, 1 }
 0x24c   : > { %1734 = vst [vmem:[%s2554_s28] sm:$0x1] %v1733_v54  ;;  %v1759_v55 = vadd.f32 %v1758_v63, %v1757_v60 }
 0x24e   : > { %1760 = vst [vmem:[%s2554_s28 + $0x1] sm:$0x1] %v1759_v55 }
 0x24f PF: > { %s15_s21 = sadd.s32 1, %s2458_s21   ;;  %s2963_s0 = sld [smem:[#allocation3_spill]] }
 0x250   : > { %p12_p12 = scmp.ge.s32.totalorder %s15_s21, 26   ;;  %s2964_s15 = smov %s2446_s18 }
 0x251   : > { %s2965_s16 = smov %s2450_s19  ;;  %s2966_s17 = smov %s2454_s20 }
 0x252   : > { %s2967_s18 = smov %s2971_s22  ;;  %s2968_s19 = smov %s2975_s23 }
 0x253   :  { %14 = sbr.rel (!%p12_p12) target bundleno = 4 (0x4), region = 93 }
 0x255   : > { %s2969_s20 = smov %s2963_s0 }

</bundles_post_ra>
